<compile_context>
chip_gen: v5e
topology: v5e:2x2
jax: 0.10.0
libtpu: 0.0.40
codegen_flags: <defaults>
</compile_context>

<pallas_src>
import jax
import jax.numpy as jnp
from jax.experimental import pallas as pl
from jax.experimental.pallas import tpu as pltpu


# ---------------------------------------------------------------------------
# Parameter preparation (host side, tiny, done once per call)
# ---------------------------------------------------------------------------

def _prepare_params(params):
    """Reshape biases to (1, C) (2-D for TPU) and split the fusion linear weight so the
    kernel never needs a feature-dim concatenation."""
    def fix_block(blk):
        out = {"w1": blk["w1"], "b1": blk["b1"].reshape(1, -1),
               "w2": blk["w2"], "b2": blk["b2"].reshape(1, -1)}
        if "wd" in blk:
            out["wd"] = blk["wd"]
            out["bd"] = blk["bd"].reshape(1, -1)
        return out

    c_a = params["tcn_A"][-1]["w2"].shape[2]     # channels produced by TCN_A
    return {
        "tcn_A": [fix_block(b) for b in params["tcn_A"]],
        "tcn_B": [fix_block(b) for b in params["tcn_B"]],
        "lin_wA": params["lin_w"][:c_a, :],
        "lin_wB": params["lin_w"][c_a:, :],
        "lin_b": params["lin_b"].reshape(1, -1),
    }


# ---------------------------------------------------------------------------
# Fused forward: both TCN stacks + residuals + concat-linear + softmax
# ---------------------------------------------------------------------------

def tcn_fusion_forward(params, A, B):
    Bn, L, CA_in = A.shape
    _, _, CB_in = B.shape
    O = params["lin_b"].shape[0]
    k = params["tcn_A"][0]["w1"].shape[0]

    prepared = _prepare_params(params)
    flat_w, treedef = jax.tree_util.tree_flatten(prepared)

    # Widest activation (all activations share one padded VMEM scratch buffer).
    widths = [CA_in, CB_in]
    for name in ("tcn_A", "tcn_B"):
        for blk in params[name]:
            widths.append(blk["w1"].shape[2])
    c_max = max(widths)

    # Largest causal pad needed: (k-1) * 2**(num_blocks-1); round up to a sublane multiple
    # so the activation store at row PAD is sublane-aligned.
    max_pad = 0
    for name in ("tcn_A", "tcn_B"):
        n_blk = len(params[name])
        max_pad = max(max_pad, (k - 1) * (2 ** (n_blk - 1)))
    PAD = ((max(max_pad, 1) + 7) // 8) * 8

    def kernel(*refs):
        a_ref, b_ref = refs[0], refs[1]
        o_ref, pad_ref = refs[-2], refs[-1]
        wrefs = refs[2:-2]
        p = jax.tree_util.tree_unflatten(treedef, wrefs)   # same pytree, leaves = refs

        # Zero the causal-padding rows once; they are never written again.
        pad_ref[0:PAD, :] = jnp.zeros((PAD, c_max), jnp.float32)

        def causal_conv(x, w_ref, bias_ref, dilation):
            # x: (L, Cin) value.  Equivalent to Conv1d(padding=(k-1)*d) + Chomp1d((k-1)*d).
            Lx, Cin = x.shape
            kk, _, Cout = w_ref.shape
            pd = (kk - 1) * dilation
            pad_ref[PAD:PAD + Lx, 0:Cin] = x               # activation below the zero rows
            acc = jnp.zeros((Lx, Cout), jnp.float32)
            for j in range(kk):                            # static unroll over taps
                start = PAD - pd + j * dilation
                acc = acc + jnp.dot(pad_ref[start:start + Lx, 0:Cin], w_ref[j],
                                    preferred_element_type=jnp.float32)
            return acc + bias_ref[...]

        def temporal_block(x, blk, dilation):
            h = jnp.maximum(causal_conv(x, blk["w1"], blk["b1"], dilation), 0.0)
            h = jnp.maximum(causal_conv(h, blk["w2"], blk["b2"], dilation), 0.0)
            if "wd" in blk:                                # 1x1 downsample conv == matmul
                res = jnp.dot(x, blk["wd"][0],
                              preferred_element_type=jnp.float32) + blk["bd"][...]
            else:
                res = x
            return jnp.maximum(h + res, 0.0)               # fused residual add + relu

        def run_tcn(x, blocks):
            for i, blk in enumerate(blocks):
                x = temporal_block(x, blk, 2 ** i)
            return x

        out_a = run_tcn(a_ref[0], p["tcn_A"])              # (L, C_A)
        out_b = run_tcn(b_ref[0], p["tcn_B"])              # (L, C_B)

        # concat([out_a, out_b]) @ lin_w  ==  out_a @ lin_wA + out_b @ lin_wB
        logits = (jnp.dot(out_a, p["lin_wA"][...], preferred_element_type=jnp.float32)
                  + jnp.dot(out_b, p["lin_wB"][...], preferred_element_type=jnp.float32)
                  + p["lin_b"][...])

        m = jnp.max(logits, axis=-1, keepdims=True)
        e = jnp.exp(logits - m)
        denom = jnp.sum(e, axis=-1, keepdims=True)
        o_ref[0] = (e * pl.reciprocal(denom, approx=False)).astype(o_ref.dtype)

    weight_specs = [pl.BlockSpec(a.shape, lambda i, nd=a.ndim: (0,) * nd) for a in flat_w]

    return pl.pallas_call(
        kernel,
        out_shape=jax.ShapeDtypeStruct((Bn, L, O), jnp.float32),
        grid=(Bn,),
        in_specs=[pl.BlockSpec((1, L, CA_in), lambda i: (i, 0, 0)),
                  pl.BlockSpec((1, L, CB_in), lambda i: (i, 0, 0))] + weight_specs,
        out_specs=pl.BlockSpec((1, L, O), lambda i: (i, 0, 0)),
        scratch_shapes=[pltpu.VMEM((PAD + L, c_max), jnp.float32)],
        compiler_params=pltpu.CompilerParams(dimension_semantics=("parallel",)),
    )(A, B, *flat_w)


# ---------------------------------------------------------------------------
# Parameter init (deterministic, synthetic -- mirrors TCN's normal_(0, 0.01))
# ---------------------------------------------------------------------------

def init_tcn_params(key, num_inputs, num_channels, kernel_size):
    blocks = []
    for i, out_c in enumerate(num_channels):
        in_c = num_inputs if i == 0 else num_channels[i - 1]
        key, k1, k2, k3, k4, k5, k6 = jax.random.split(key, 7)
        p = {
            "w1": 0.01 * jax.random.normal(k1, (kernel_size, in_c, out_c), jnp.float32),
            "b1": 0.01 * jax.random.normal(k2, (out_c,), jnp.float32),
            "w2": 0.01 * jax.random.normal(k3, (kernel_size, out_c, out_c), jnp.float32),
            "b2": 0.01 * jax.random.normal(k4, (out_c,), jnp.float32),
        }
        if in_c != out_c:
            p["wd"] = 0.01 * jax.random.normal(k5, (1, in_c, out_c), jnp.float32)
            p["bd"] = 0.01 * jax.random.normal(k6, (out_c,), jnp.float32)
        blocks.append(p)
    return key, blocks


def init_fusion_params(key, A_input_size, B_input_size, num_A_channels,
                       num_B_channels, kernel_size, output_size):
    key, tcn_A = init_tcn_params(key, A_input_size, num_A_channels, kernel_size)
    key, tcn_B = init_tcn_params(key, B_input_size, num_B_channels, kernel_size)
    key, kw, kb = jax.random.split(key, 3)
    fuse_in = num_B_channels[-1] * 2
    lin_w = 0.05 * jax.random.normal(kw, (fuse_in, output_size), jnp.float32)
    lin_b = 0.05 * jax.random.normal(kb, (output_size,), jnp.float32)
    return {"tcn_A": tcn_A, "tcn_B": tcn_B, "lin_w": lin_w, "lin_b": lin_b}


if __name__ == "__main__":
    # Small, module-consistent shapes.
    batch, seq = 2, 16
    A_input_size, B_input_size = 8, 12
    num_A_channels = [16, 16]
    num_B_channels = [16, 16]
    kernel_size = 3
    output_size = 5

    key = jax.random.PRNGKey(0)
    key, ka, kb, kp = jax.random.split(key, 4)
    A = jax.random.normal(ka, (batch, seq, A_input_size), jnp.float32)
    B = jax.random.normal(kb, (batch, seq, B_input_size), jnp.float32)

    params = init_fusion_params(kp, A_input_size, B_input_size,
                                num_A_channels, num_B_channels,
                                kernel_size, output_size)

    out = tcn_fusion_forward(params, A, B)
    out = jax.block_until_ready(out)

    assert out.shape == (batch, seq, output_size)
    # softmax rows must sum to 1
    assert bool(jnp.allclose(jnp.sum(out, axis=-1), 1.0, atol=1e-5))
    print("KERNEL_OK")
</pallas_src>

<mosaic_0001>
module attributes {stable_mosaic.version = 11 : i64} {
  func.func @kernel(%arg0: i32, %arg1: memref<1x16x8xf32, #tpu.memory_space<vmem>>, %arg2: memref<1x16x12xf32, #tpu.memory_space<vmem>>, %arg3: memref<1x5xf32, #tpu.memory_space<vmem>>, %arg4: memref<16x5xf32, #tpu.memory_space<vmem>>, %arg5: memref<16x5xf32, #tpu.memory_space<vmem>>, %arg6: memref<1x16xf32, #tpu.memory_space<vmem>>, %arg7: memref<1x16xf32, #tpu.memory_space<vmem>>, %arg8: memref<1x16xf32, #tpu.memory_space<vmem>>, %arg9: memref<3x8x16xf32, #tpu.memory_space<vmem>>, %arg10: memref<3x16x16xf32, #tpu.memory_space<vmem>>, %arg11: memref<1x8x16xf32, #tpu.memory_space<vmem>>, %arg12: memref<1x16xf32, #tpu.memory_space<vmem>>, %arg13: memref<1x16xf32, #tpu.memory_space<vmem>>, %arg14: memref<3x16x16xf32, #tpu.memory_space<vmem>>, %arg15: memref<3x16x16xf32, #tpu.memory_space<vmem>>, %arg16: memref<1x16xf32, #tpu.memory_space<vmem>>, %arg17: memref<1x16xf32, #tpu.memory_space<vmem>>, %arg18: memref<1x16xf32, #tpu.memory_space<vmem>>, %arg19: memref<3x12x16xf32, #tpu.memory_space<vmem>>, %arg20: memref<3x16x16xf32, #tpu.memory_space<vmem>>, %arg21: memref<1x12x16xf32, #tpu.memory_space<vmem>>, %arg22: memref<1x16xf32, #tpu.memory_space<vmem>>, %arg23: memref<1x16xf32, #tpu.memory_space<vmem>>, %arg24: memref<3x16x16xf32, #tpu.memory_space<vmem>>, %arg25: memref<3x16x16xf32, #tpu.memory_space<vmem>>, %arg26: memref<1x16x5xf32, #tpu.memory_space<vmem>>, %arg27: memref<24x16xf32, #tpu.memory_space<vmem>>) attributes {dimension_semantics = [#tpu.dimension_semantics<parallel>], iteration_bounds = array<i64: 2>, scalar_prefetch = 0 : i64, scratch_operands = 1 : i64, tpu.core_type = #tpu.core_type<tc>, window_params = [{transform_indices = @transform_0, window_bounds = array<i64: 1, 16, 8>}, {transform_indices = @transform_1, window_bounds = array<i64: 1, 16, 12>}, {pipeline_mode = #tpu.pipeline_mode<synchronous>, transform_indices = @transform_2, window_bounds = array<i64: 1, 5>}, {pipeline_mode = #tpu.pipeline_mode<synchronous>, transform_indices = @transform_3, window_bounds = array<i64: 16, 5>}, {pipeline_mode = #tpu.pipeline_mode<synchronous>, transform_indices = @transform_4, window_bounds = array<i64: 16, 5>}, {pipeline_mode = #tpu.pipeline_mode<synchronous>, transform_indices = @transform_5, window_bounds = array<i64: 1, 16>}, {pipeline_mode = #tpu.pipeline_mode<synchronous>, transform_indices = @transform_6, window_bounds = array<i64: 1, 16>}, {pipeline_mode = #tpu.pipeline_mode<synchronous>, transform_indices = @transform_7, window_bounds = array<i64: 1, 16>}, {pipeline_mode = #tpu.pipeline_mode<synchronous>, transform_indices = @transform_8, window_bounds = array<i64: 3, 8, 16>}, {pipeline_mode = #tpu.pipeline_mode<synchronous>, transform_indices = @transform_9, window_bounds = array<i64: 3, 16, 16>}, {pipeline_mode = #tpu.pipeline_mode<synchronous>, transform_indices = @transform_10, window_bounds = array<i64: 1, 8, 16>}, {pipeline_mode = #tpu.pipeline_mode<synchronous>, transform_indices = @transform_11, window_bounds = array<i64: 1, 16>}, {pipeline_mode = #tpu.pipeline_mode<synchronous>, transform_indices = @transform_12, window_bounds = array<i64: 1, 16>}, {pipeline_mode = #tpu.pipeline_mode<synchronous>, transform_indices = @transform_13, window_bounds = array<i64: 3, 16, 16>}, {pipeline_mode = #tpu.pipeline_mode<synchronous>, transform_indices = @transform_14, window_bounds = array<i64: 3, 16, 16>}, {pipeline_mode = #tpu.pipeline_mode<synchronous>, transform_indices = @transform_15, window_bounds = array<i64: 1, 16>}, {pipeline_mode = #tpu.pipeline_mode<synchronous>, transform_indices = @transform_16, window_bounds = array<i64: 1, 16>}, {pipeline_mode = #tpu.pipeline_mode<synchronous>, transform_indices = @transform_17, window_bounds = array<i64: 1, 16>}, {pipeline_mode = #tpu.pipeline_mode<synchronous>, transform_indices = @transform_18, window_bounds = array<i64: 3, 12, 16>}, {pipeline_mode = #tpu.pipeline_mode<synchronous>, transform_indices = @transform_19, window_bounds = array<i64: 3, 16, 16>}, {pipeline_mode = #tpu.pipeline_mode<synchronous>, transform_indices = @transform_20, window_bounds = array<i64: 1, 12, 16>}, {pipeline_mode = #tpu.pipeline_mode<synchronous>, transform_indices = @transform_21, window_bounds = array<i64: 1, 16>}, {pipeline_mode = #tpu.pipeline_mode<synchronous>, transform_indices = @transform_22, window_bounds = array<i64: 1, 16>}, {pipeline_mode = #tpu.pipeline_mode<synchronous>, transform_indices = @transform_23, window_bounds = array<i64: 3, 16, 16>}, {pipeline_mode = #tpu.pipeline_mode<synchronous>, transform_indices = @transform_24, window_bounds = array<i64: 3, 16, 16>}, {transform_indices = @transform_25, window_bounds = array<i64: 1, 16, 5>}]} {
    %cst = arith.constant 0.000000e+00 : f32
    %0 = vector.broadcast %cst : f32 to vector<8x16xf32>
    %c0 = arith.constant 0 : index
    %c0_0 = arith.constant 0 : index
    %1 = vector.load %arg27[%c0, %c0_0] : memref<24x16xf32, #tpu.memory_space<vmem>>, vector<8x16xf32>
    tpu.vector_store %arg27[%c0, %c0_0], %0 {strides = array<i32>} : memref<24x16xf32, #tpu.memory_space<vmem>>, vector<8x16xf32>,
    %c0_1 = arith.constant 0 : index
    %c0_2 = arith.constant 0 : index
    %c0_3 = arith.constant 0 : index
    %2 = vector.load %arg1[%c0_1, %c0_2, %c0_3] : memref<1x16x8xf32, #tpu.memory_space<vmem>>, vector<1x16x8xf32>
    %3 = vector.shape_cast %2 : vector<1x16x8xf32> to vector<16x8xf32>
    %c8 = arith.constant 8 : index
    %c0_4 = arith.constant 0 : index
    %4 = vector.load %arg27[%c8, %c0_4] : memref<24x16xf32, #tpu.memory_space<vmem>>, vector<16x8xf32>
    tpu.vector_store %arg27[%c8, %c0_4], %3 {strides = array<i32>} : memref<24x16xf32, #tpu.memory_space<vmem>>, vector<16x8xf32>,
    %cst_5 = arith.constant 0.000000e+00 : f32
    %5 = vector.broadcast %cst_5 : f32 to vector<16x16xf32>
    %c6 = arith.constant 6 : index
    %c0_6 = arith.constant 0 : index
    %6 = vector.load %arg27[%c6, %c0_6] : memref<24x16xf32, #tpu.memory_space<vmem>>, vector<16x8xf32>
    %c0_7 = arith.constant 0 : index
    %c0_8 = arith.constant 0 : index
    %c0_9 = arith.constant 0 : index
    %7 = vector.load %arg9[%c0_7, %c0_8, %c0_9] : memref<3x8x16xf32, #tpu.memory_space<vmem>>, vector<1x8x16xf32>
    %8 = vector.shape_cast %7 : vector<1x8x16xf32> to vector<8x16xf32>
    %cst_10 = arith.constant dense<0.000000e+00> : vector<16x16xf32>
    %9 = tpu.matmul %6, %8, %cst_10 {dimension_numbers = #tpu.dot_dimension_numbers<[1], [0], [0], [1], [0, 0, 1, 1], [], []>} : vector<16x8xf32>, vector<8x16xf32>, vector<16x16xf32> -> vector<16x16xf32>
    %10 = arith.addf %5, %9 : vector<16x16xf32>
    %c7 = arith.constant 7 : index
    %c0_11 = arith.constant 0 : index
    %11 = vector.load %arg27[%c7, %c0_11] : memref<24x16xf32, #tpu.memory_space<vmem>>, vector<16x8xf32>
    %c1 = arith.constant 1 : index
    %c0_12 = arith.constant 0 : index
    %c0_13 = arith.constant 0 : index
    %12 = vector.load %arg9[%c1, %c0_12, %c0_13] : memref<3x8x16xf32, #tpu.memory_space<vmem>>, vector<1x8x16xf32>
    %13 = vector.shape_cast %12 : vector<1x8x16xf32> to vector<8x16xf32>
    %cst_14 = arith.constant dense<0.000000e+00> : vector<16x16xf32>
    %14 = tpu.matmul %11, %13, %cst_14 {dimension_numbers = #tpu.dot_dimension_numbers<[1], [0], [0], [1], [0, 0, 1, 1], [], []>} : vector<16x8xf32>, vector<8x16xf32>, vector<16x16xf32> -> vector<16x16xf32>
    %15 = arith.addf %10, %14 : vector<16x16xf32>
    %c8_15 = arith.constant 8 : index
    %c0_16 = arith.constant 0 : index
    %16 = vector.load %arg27[%c8_15, %c0_16] : memref<24x16xf32, #tpu.memory_space<vmem>>, vector<16x8xf32>
    %c2 = arith.constant 2 : index
    %c0_17 = arith.constant 0 : index
    %c0_18 = arith.constant 0 : index
    %17 = vector.load %arg9[%c2, %c0_17, %c0_18] : memref<3x8x16xf32, #tpu.memory_space<vmem>>, vector<1x8x16xf32>
    %18 = vector.shape_cast %17 : vector<1x8x16xf32> to vector<8x16xf32>
    %cst_19 = arith.constant dense<0.000000e+00> : vector<16x16xf32>
    %19 = tpu.matmul %16, %18, %cst_19 {dimension_numbers = #tpu.dot_dimension_numbers<[1], [0], [0], [1], [0, 0, 1, 1], [], []>} : vector<16x8xf32>, vector<8x16xf32>, vector<16x16xf32> -> vector<16x16xf32>
    %20 = arith.addf %15, %19 : vector<16x16xf32>
    %c0_20 = arith.constant 0 : index
    %c0_21 = arith.constant 0 : index
    %21 = vector.load %arg6[%c0_20, %c0_21] : memref<1x16xf32, #tpu.memory_space<vmem>>, vector<1x16xf32>
    %22 = vector.broadcast %21 : vector<1x16xf32> to vector<16x16xf32>
    %23 = arith.addf %20, %22 : vector<16x16xf32>
    %cst_22 = arith.constant 0.000000e+00 : f32
    %24 = vector.broadcast %cst_22 : f32 to vector<16x16xf32>
    %25 = arith.maximumf %23, %24 : vector<16x16xf32>
    %c8_23 = arith.constant 8 : index
    %c0_24 = arith.constant 0 : index
    %26 = vector.load %arg27[%c8_23, %c0_24] : memref<24x16xf32, #tpu.memory_space<vmem>>, vector<16x16xf32>
    tpu.vector_store %arg27[%c8_23, %c0_24], %25 {strides = array<i32>} : memref<24x16xf32, #tpu.memory_space<vmem>>, vector<16x16xf32>,
    %cst_25 = arith.constant 0.000000e+00 : f32
    %27 = vector.broadcast %cst_25 : f32 to vector<16x16xf32>
    %c6_26 = arith.constant 6 : index
    %c0_27 = arith.constant 0 : index
    %28 = vector.load %arg27[%c6_26, %c0_27] : memref<24x16xf32, #tpu.memory_space<vmem>>, vector<16x16xf32>
    %c0_28 = arith.constant 0 : index
    %c0_29 = arith.constant 0 : index
    %c0_30 = arith.constant 0 : index
    %29 = vector.load %arg10[%c0_28, %c0_29, %c0_30] : memref<3x16x16xf32, #tpu.memory_space<vmem>>, vector<1x16x16xf32>
    %30 = vector.shape_cast %29 : vector<1x16x16xf32> to vector<16x16xf32>
    %cst_31 = arith.constant dense<0.000000e+00> : vector<16x16xf32>
    %31 = tpu.matmul %28, %30, %cst_31 {dimension_numbers = #tpu.dot_dimension_numbers<[1], [0], [0], [1], [0, 0, 1, 1], [], []>} : vector<16x16xf32>, vector<16x16xf32>, vector<16x16xf32> -> vector<16x16xf32>
    %32 = arith.addf %27, %31 : vector<16x16xf32>
    %c7_32 = arith.constant 7 : index
    %c0_33 = arith.constant 0 : index
    %33 = vector.load %arg27[%c7_32, %c0_33] : memref<24x16xf32, #tpu.memory_space<vmem>>, vector<16x16xf32>
    %c1_34 = arith.constant 1 : index
    %c0_35 = arith.constant 0 : index
    %c0_36 = arith.constant 0 : index
    %34 = vector.load %arg10[%c1_34, %c0_35, %c0_36] : memref<3x16x16xf32, #tpu.memory_space<vmem>>, vector<1x16x16xf32>
    %35 = vector.shape_cast %34 : vector<1x16x16xf32> to vector<16x16xf32>
    %cst_37 = arith.constant dense<0.000000e+00> : vector<16x16xf32>
    %36 = tpu.matmul %33, %35, %cst_37 {dimension_numbers = #tpu.dot_dimension_numbers<[1], [0], [0], [1], [0, 0, 1, 1], [], []>} : vector<16x16xf32>, vector<16x16xf32>, vector<16x16xf32> -> vector<16x16xf32>
    %37 = arith.addf %32, %36 : vector<16x16xf32>
    %c8_38 = arith.constant 8 : index
    %c0_39 = arith.constant 0 : index
    %38 = vector.load %arg27[%c8_38, %c0_39] : memref<24x16xf32, #tpu.memory_space<vmem>>, vector<16x16xf32>
    %c2_40 = arith.constant 2 : index
    %c0_41 = arith.constant 0 : index
    %c0_42 = arith.constant 0 : index
    %39 = vector.load %arg10[%c2_40, %c0_41, %c0_42] : memref<3x16x16xf32, #tpu.memory_space<vmem>>, vector<1x16x16xf32>
    %40 = vector.shape_cast %39 : vector<1x16x16xf32> to vector<16x16xf32>
    %cst_43 = arith.constant dense<0.000000e+00> : vector<16x16xf32>
    %41 = tpu.matmul %38, %40, %cst_43 {dimension_numbers = #tpu.dot_dimension_numbers<[1], [0], [0], [1], [0, 0, 1, 1], [], []>} : vector<16x16xf32>, vector<16x16xf32>, vector<16x16xf32> -> vector<16x16xf32>
    %42 = arith.addf %37, %41 : vector<16x16xf32>
    %c0_44 = arith.constant 0 : index
    %c0_45 = arith.constant 0 : index
    %43 = vector.load %arg7[%c0_44, %c0_45] : memref<1x16xf32, #tpu.memory_space<vmem>>, vector<1x16xf32>
    %44 = vector.broadcast %43 : vector<1x16xf32> to vector<16x16xf32>
    %45 = arith.addf %42, %44 : vector<16x16xf32>
    %cst_46 = arith.constant 0.000000e+00 : f32
    %46 = vector.broadcast %cst_46 : f32 to vector<16x16xf32>
    %47 = arith.maximumf %45, %46 : vector<16x16xf32>
    %c0_47 = arith.constant 0 : index
    %c0_48 = arith.constant 0 : index
    %c0_49 = arith.constant 0 : index
    %48 = vector.load %arg11[%c0_47, %c0_48, %c0_49] : memref<1x8x16xf32, #tpu.memory_space<vmem>>, vector<1x8x16xf32>
    %49 = vector.shape_cast %48 : vector<1x8x16xf32> to vector<8x16xf32>
    %cst_50 = arith.constant dense<0.000000e+00> : vector<16x16xf32>
    %50 = tpu.matmul %3, %49, %cst_50 {dimension_numbers = #tpu.dot_dimension_numbers<[1], [0], [0], [1], [0, 0, 1, 1], [], []>} : vector<16x8xf32>, vector<8x16xf32>, vector<16x16xf32> -> vector<16x16xf32>
    %c0_51 = arith.constant 0 : index
    %c0_52 = arith.constant 0 : index
    %51 = vector.load %arg8[%c0_51, %c0_52] : memref<1x16xf32, #tpu.memory_space<vmem>>, vector<1x16xf32>
    %52 = vector.broadcast %51 : vector<1x16xf32> to vector<16x16xf32>
    %53 = arith.addf %50, %52 : vector<16x16xf32>
    %54 = arith.addf %47, %53 : vector<16x16xf32>
    %cst_53 = arith.constant 0.000000e+00 : f32
    %55 = vector.broadcast %cst_53 : f32 to vector<16x16xf32>
    %56 = arith.maximumf %54, %55 : vector<16x16xf32>
    %c8_54 = arith.constant 8 : index
    %c0_55 = arith.constant 0 : index
    %57 = vector.load %arg27[%c8_54, %c0_55] : memref<24x16xf32, #tpu.memory_space<vmem>>, vector<16x16xf32>
    tpu.vector_store %arg27[%c8_54, %c0_55], %56 {strides = array<i32>} : memref<24x16xf32, #tpu.memory_space<vmem>>, vector<16x16xf32>,
    %cst_56 = arith.constant 0.000000e+00 : f32
    %58 = vector.broadcast %cst_56 : f32 to vector<16x16xf32>
    %c4 = arith.constant 4 : index
    %c0_57 = arith.constant 0 : index
    %59 = vector.load %arg27[%c4, %c0_57] : memref<24x16xf32, #tpu.memory_space<vmem>>, vector<16x16xf32>
    %c0_58 = arith.constant 0 : index
    %c0_59 = arith.constant 0 : index
    %c0_60 = arith.constant 0 : index
    %60 = vector.load %arg14[%c0_58, %c0_59, %c0_60] : memref<3x16x16xf32, #tpu.memory_space<vmem>>, vector<1x16x16xf32>
    %61 = vector.shape_cast %60 : vector<1x16x16xf32> to vector<16x16xf32>
    %cst_61 = arith.constant dense<0.000000e+00> : vector<16x16xf32>
    %62 = tpu.matmul %59, %61, %cst_61 {dimension_numbers = #tpu.dot_dimension_numbers<[1], [0], [0], [1], [0, 0, 1, 1], [], []>} : vector<16x16xf32>, vector<16x16xf32>, vector<16x16xf32> -> vector<16x16xf32>
    %63 = arith.addf %58, %62 : vector<16x16xf32>
    %c6_62 = arith.constant 6 : index
    %c0_63 = arith.constant 0 : index
    %64 = vector.load %arg27[%c6_62, %c0_63] : memref<24x16xf32, #tpu.memory_space<vmem>>, vector<16x16xf32>
    %c1_64 = arith.constant 1 : index
    %c0_65 = arith.constant 0 : index
    %c0_66 = arith.constant 0 : index
    %65 = vector.load %arg14[%c1_64, %c0_65, %c0_66] : memref<3x16x16xf32, #tpu.memory_space<vmem>>, vector<1x16x16xf32>
    %66 = vector.shape_cast %65 : vector<1x16x16xf32> to vector<16x16xf32>
    %cst_67 = arith.constant dense<0.000000e+00> : vector<16x16xf32>
    %67 = tpu.matmul %64, %66, %cst_67 {dimension_numbers = #tpu.dot_dimension_numbers<[1], [0], [0], [1], [0, 0, 1, 1], [], []>} : vector<16x16xf32>, vector<16x16xf32>, vector<16x16xf32> -> vector<16x16xf32>
    %68 = arith.addf %63, %67 : vector<16x16xf32>
    %c8_68 = arith.constant 8 : index
    %c0_69 = arith.constant 0 : index
    %69 = vector.load %arg27[%c8_68, %c0_69] : memref<24x16xf32, #tpu.memory_space<vmem>>, vector<16x16xf32>
    %c2_70 = arith.constant 2 : index
    %c0_71 = arith.constant 0 : index
    %c0_72 = arith.constant 0 : index
    %70 = vector.load %arg14[%c2_70, %c0_71, %c0_72] : memref<3x16x16xf32, #tpu.memory_space<vmem>>, vector<1x16x16xf32>
    %71 = vector.shape_cast %70 : vector<1x16x16xf32> to vector<16x16xf32>
    %cst_73 = arith.constant dense<0.000000e+00> : vector<16x16xf32>
    %72 = tpu.matmul %69, %71, %cst_73 {dimension_numbers = #tpu.dot_dimension_numbers<[1], [0], [0], [1], [0, 0, 1, 1], [], []>} : vector<16x16xf32>, vector<16x16xf32>, vector<16x16xf32> -> vector<16x16xf32>
    %73 = arith.addf %68, %72 : vector<16x16xf32>
    %c0_74 = arith.constant 0 : index
    %c0_75 = arith.constant 0 : index
    %74 = vector.load %arg12[%c0_74, %c0_75] : memref<1x16xf32, #tpu.memory_space<vmem>>, vector<1x16xf32>
    %75 = vector.broadcast %74 : vector<1x16xf32> to vector<16x16xf32>
    %76 = arith.addf %73, %75 : vector<16x16xf32>
    %cst_76 = arith.constant 0.000000e+00 : f32
    %77 = vector.broadcast %cst_76 : f32 to vector<16x16xf32>
    %78 = arith.maximumf %76, %77 : vector<16x16xf32>
    %c8_77 = arith.constant 8 : index
    %c0_78 = arith.constant 0 : index
    %79 = vector.load %arg27[%c8_77, %c0_78] : memref<24x16xf32, #tpu.memory_space<vmem>>, vector<16x16xf32>
    tpu.vector_store %arg27[%c8_77, %c0_78], %78 {strides = array<i32>} : memref<24x16xf32, #tpu.memory_space<vmem>>, vector<16x16xf32>,
    %cst_79 = arith.constant 0.000000e+00 : f32
    %80 = vector.broadcast %cst_79 : f32 to vector<16x16xf32>
    %c4_80 = arith.constant 4 : index
    %c0_81 = arith.constant 0 : index
    %81 = vector.load %arg27[%c4_80, %c0_81] : memref<24x16xf32, #tpu.memory_space<vmem>>, vector<16x16xf32>
    %c0_82 = arith.constant 0 : index
    %c0_83 = arith.constant 0 : index
    %c0_84 = arith.constant 0 : index
    %82 = vector.load %arg15[%c0_82, %c0_83, %c0_84] : memref<3x16x16xf32, #tpu.memory_space<vmem>>, vector<1x16x16xf32>
    %83 = vector.shape_cast %82 : vector<1x16x16xf32> to vector<16x16xf32>
    %cst_85 = arith.constant dense<0.000000e+00> : vector<16x16xf32>
    %84 = tpu.matmul %81, %83, %cst_85 {dimension_numbers = #tpu.dot_dimension_numbers<[1], [0], [0], [1], [0, 0, 1, 1], [], []>} : vector<16x16xf32>, vector<16x16xf32>, vector<16x16xf32> -> vector<16x16xf32>
    %85 = arith.addf %80, %84 : vector<16x16xf32>
    %c6_86 = arith.constant 6 : index
    %c0_87 = arith.constant 0 : index
    %86 = vector.load %arg27[%c6_86, %c0_87] : memref<24x16xf32, #tpu.memory_space<vmem>>, vector<16x16xf32>
    %c1_88 = arith.constant 1 : index
    %c0_89 = arith.constant 0 : index
    %c0_90 = arith.constant 0 : index
    %87 = vector.load %arg15[%c1_88, %c0_89, %c0_90] : memref<3x16x16xf32, #tpu.memory_space<vmem>>, vector<1x16x16xf32>
    %88 = vector.shape_cast %87 : vector<1x16x16xf32> to vector<16x16xf32>
    %cst_91 = arith.constant dense<0.000000e+00> : vector<16x16xf32>
    %89 = tpu.matmul %86, %88, %cst_91 {dimension_numbers = #tpu.dot_dimension_numbers<[1], [0], [0], [1], [0, 0, 1, 1], [], []>} : vector<16x16xf32>, vector<16x16xf32>, vector<16x16xf32> -> vector<16x16xf32>
    %90 = arith.addf %85, %89 : vector<16x16xf32>
    %c8_92 = arith.constant 8 : index
    %c0_93 = arith.constant 0 : index
    %91 = vector.load %arg27[%c8_92, %c0_93] : memref<24x16xf32, #tpu.memory_space<vmem>>, vector<16x16xf32>
    %c2_94 = arith.constant 2 : index
    %c0_95 = arith.constant 0 : index
    %c0_96 = arith.constant 0 : index
    %92 = vector.load %arg15[%c2_94, %c0_95, %c0_96] : memref<3x16x16xf32, #tpu.memory_space<vmem>>, vector<1x16x16xf32>
    %93 = vector.shape_cast %92 : vector<1x16x16xf32> to vector<16x16xf32>
    %cst_97 = arith.constant dense<0.000000e+00> : vector<16x16xf32>
    %94 = tpu.matmul %91, %93, %cst_97 {dimension_numbers = #tpu.dot_dimension_numbers<[1], [0], [0], [1], [0, 0, 1, 1], [], []>} : vector<16x16xf32>, vector<16x16xf32>, vector<16x16xf32> -> vector<16x16xf32>
    %95 = arith.addf %90, %94 : vector<16x16xf32>
    %c0_98 = arith.constant 0 : index
    %c0_99 = arith.constant 0 : index
    %96 = vector.load %arg13[%c0_98, %c0_99] : memref<1x16xf32, #tpu.memory_space<vmem>>, vector<1x16xf32>
    %97 = vector.broadcast %96 : vector<1x16xf32> to vector<16x16xf32>
    %98 = arith.addf %95, %97 : vector<16x16xf32>
    %cst_100 = arith.constant 0.000000e+00 : f32
    %99 = vector.broadcast %cst_100 : f32 to vector<16x16xf32>
    %100 = arith.maximumf %98, %99 : vector<16x16xf32>
    %101 = arith.addf %100, %56 : vector<16x16xf32>
    %cst_101 = arith.constant 0.000000e+00 : f32
    %102 = vector.broadcast %cst_101 : f32 to vector<16x16xf32>
    %103 = arith.maximumf %101, %102 : vector<16x16xf32>
    %c0_102 = arith.constant 0 : index
    %c0_103 = arith.constant 0 : index
    %c0_104 = arith.constant 0 : index
    %104 = vector.load %arg2[%c0_102, %c0_103, %c0_104] : memref<1x16x12xf32, #tpu.memory_space<vmem>>, vector<1x16x12xf32>
    %105 = vector.shape_cast %104 : vector<1x16x12xf32> to vector<16x12xf32>
    %c8_105 = arith.constant 8 : index
    %c0_106 = arith.constant 0 : index
    %106 = vector.load %arg27[%c8_105, %c0_106] : memref<24x16xf32, #tpu.memory_space<vmem>>, vector<16x12xf32>
    tpu.vector_store %arg27[%c8_105, %c0_106], %105 {strides = array<i32>} : memref<24x16xf32, #tpu.memory_space<vmem>>, vector<16x12xf32>,
    %cst_107 = arith.constant 0.000000e+00 : f32
    %107 = vector.broadcast %cst_107 : f32 to vector<16x16xf32>
    %c6_108 = arith.constant 6 : index
    %c0_109 = arith.constant 0 : index
    %108 = vector.load %arg27[%c6_108, %c0_109] : memref<24x16xf32, #tpu.memory_space<vmem>>, vector<16x12xf32>
    %c0_110 = arith.constant 0 : index
    %c0_111 = arith.constant 0 : index
    %c0_112 = arith.constant 0 : index
    %109 = vector.load %arg19[%c0_110, %c0_111, %c0_112] : memref<3x12x16xf32, #tpu.memory_space<vmem>>, vector<1x12x16xf32>
    %110 = vector.shape_cast %109 : vector<1x12x16xf32> to vector<12x16xf32>
    %cst_113 = arith.constant dense<0.000000e+00> : vector<16x16xf32>
    %111 = tpu.matmul %108, %110, %cst_113 {dimension_numbers = #tpu.dot_dimension_numbers<[1], [0], [0], [1], [0, 0, 1, 1], [], []>} : vector<16x12xf32>, vector<12x16xf32>, vector<16x16xf32> -> vector<16x16xf32>
    %112 = arith.addf %107, %111 : vector<16x16xf32>
    %c7_114 = arith.constant 7 : index
    %c0_115 = arith.constant 0 : index
    %113 = vector.load %arg27[%c7_114, %c0_115] : memref<24x16xf32, #tpu.memory_space<vmem>>, vector<16x12xf32>
    %c1_116 = arith.constant 1 : index
    %c0_117 = arith.constant 0 : index
    %c0_118 = arith.constant 0 : index
    %114 = vector.load %arg19[%c1_116, %c0_117, %c0_118] : memref<3x12x16xf32, #tpu.memory_space<vmem>>, vector<1x12x16xf32>
    %115 = vector.shape_cast %114 : vector<1x12x16xf32> to vector<12x16xf32>
    %cst_119 = arith.constant dense<0.000000e+00> : vector<16x16xf32>
    %116 = tpu.matmul %113, %115, %cst_119 {dimension_numbers = #tpu.dot_dimension_numbers<[1], [0], [0], [1], [0, 0, 1, 1], [], []>} : vector<16x12xf32>, vector<12x16xf32>, vector<16x16xf32> -> vector<16x16xf32>
    %117 = arith.addf %112, %116 : vector<16x16xf32>
    %c8_120 = arith.constant 8 : index
    %c0_121 = arith.constant 0 : index
    %118 = vector.load %arg27[%c8_120, %c0_121] : memref<24x16xf32, #tpu.memory_space<vmem>>, vector<16x12xf32>
    %c2_122 = arith.constant 2 : index
    %c0_123 = arith.constant 0 : index
    %c0_124 = arith.constant 0 : index
    %119 = vector.load %arg19[%c2_122, %c0_123, %c0_124] : memref<3x12x16xf32, #tpu.memory_space<vmem>>, vector<1x12x16xf32>
    %120 = vector.shape_cast %119 : vector<1x12x16xf32> to vector<12x16xf32>
    %cst_125 = arith.constant dense<0.000000e+00> : vector<16x16xf32>
    %121 = tpu.matmul %118, %120, %cst_125 {dimension_numbers = #tpu.dot_dimension_numbers<[1], [0], [0], [1], [0, 0, 1, 1], [], []>} : vector<16x12xf32>, vector<12x16xf32>, vector<16x16xf32> -> vector<16x16xf32>
    %122 = arith.addf %117, %121 : vector<16x16xf32>
    %c0_126 = arith.constant 0 : index
    %c0_127 = arith.constant 0 : index
    %123 = vector.load %arg16[%c0_126, %c0_127] : memref<1x16xf32, #tpu.memory_space<vmem>>, vector<1x16xf32>
    %124 = vector.broadcast %123 : vector<1x16xf32> to vector<16x16xf32>
    %125 = arith.addf %122, %124 : vector<16x16xf32>
    %cst_128 = arith.constant 0.000000e+00 : f32
    %126 = vector.broadcast %cst_128 : f32 to vector<16x16xf32>
    %127 = arith.maximumf %125, %126 : vector<16x16xf32>
    %c8_129 = arith.constant 8 : index
    %c0_130 = arith.constant 0 : index
    %128 = vector.load %arg27[%c8_129, %c0_130] : memref<24x16xf32, #tpu.memory_space<vmem>>, vector<16x16xf32>
    tpu.vector_store %arg27[%c8_129, %c0_130], %127 {strides = array<i32>} : memref<24x16xf32, #tpu.memory_space<vmem>>, vector<16x16xf32>,
    %cst_131 = arith.constant 0.000000e+00 : f32
    %129 = vector.broadcast %cst_131 : f32 to vector<16x16xf32>
    %c6_132 = arith.constant 6 : index
    %c0_133 = arith.constant 0 : index
    %130 = vector.load %arg27[%c6_132, %c0_133] : memref<24x16xf32, #tpu.memory_space<vmem>>, vector<16x16xf32>
    %c0_134 = arith.constant 0 : index
    %c0_135 = arith.constant 0 : index
    %c0_136 = arith.constant 0 : index
    %131 = vector.load %arg20[%c0_134, %c0_135, %c0_136] : memref<3x16x16xf32, #tpu.memory_space<vmem>>, vector<1x16x16xf32>
    %132 = vector.shape_cast %131 : vector<1x16x16xf32> to vector<16x16xf32>
    %cst_137 = arith.constant dense<0.000000e+00> : vector<16x16xf32>
    %133 = tpu.matmul %130, %132, %cst_137 {dimension_numbers = #tpu.dot_dimension_numbers<[1], [0], [0], [1], [0, 0, 1, 1], [], []>} : vector<16x16xf32>, vector<16x16xf32>, vector<16x16xf32> -> vector<16x16xf32>
    %134 = arith.addf %129, %133 : vector<16x16xf32>
    %c7_138 = arith.constant 7 : index
    %c0_139 = arith.constant 0 : index
    %135 = vector.load %arg27[%c7_138, %c0_139] : memref<24x16xf32, #tpu.memory_space<vmem>>, vector<16x16xf32>
    %c1_140 = arith.constant 1 : index
    %c0_141 = arith.constant 0 : index
    %c0_142 = arith.constant 0 : index
    %136 = vector.load %arg20[%c1_140, %c0_141, %c0_142] : memref<3x16x16xf32, #tpu.memory_space<vmem>>, vector<1x16x16xf32>
    %137 = vector.shape_cast %136 : vector<1x16x16xf32> to vector<16x16xf32>
    %cst_143 = arith.constant dense<0.000000e+00> : vector<16x16xf32>
    %138 = tpu.matmul %135, %137, %cst_143 {dimension_numbers = #tpu.dot_dimension_numbers<[1], [0], [0], [1], [0, 0, 1, 1], [], []>} : vector<16x16xf32>, vector<16x16xf32>, vector<16x16xf32> -> vector<16x16xf32>
    %139 = arith.addf %134, %138 : vector<16x16xf32>
    %c8_144 = arith.constant 8 : index
    %c0_145 = arith.constant 0 : index
    %140 = vector.load %arg27[%c8_144, %c0_145] : memref<24x16xf32, #tpu.memory_space<vmem>>, vector<16x16xf32>
    %c2_146 = arith.constant 2 : index
    %c0_147 = arith.constant 0 : index
    %c0_148 = arith.constant 0 : index
    %141 = vector.load %arg20[%c2_146, %c0_147, %c0_148] : memref<3x16x16xf32, #tpu.memory_space<vmem>>, vector<1x16x16xf32>
    %142 = vector.shape_cast %141 : vector<1x16x16xf32> to vector<16x16xf32>
    %cst_149 = arith.constant dense<0.000000e+00> : vector<16x16xf32>
    %143 = tpu.matmul %140, %142, %cst_149 {dimension_numbers = #tpu.dot_dimension_numbers<[1], [0], [0], [1], [0, 0, 1, 1], [], []>} : vector<16x16xf32>, vector<16x16xf32>, vector<16x16xf32> -> vector<16x16xf32>
    %144 = arith.addf %139, %143 : vector<16x16xf32>
    %c0_150 = arith.constant 0 : index
    %c0_151 = arith.constant 0 : index
    %145 = vector.load %arg17[%c0_150, %c0_151] : memref<1x16xf32, #tpu.memory_space<vmem>>, vector<1x16xf32>
    %146 = vector.broadcast %145 : vector<1x16xf32> to vector<16x16xf32>
    %147 = arith.addf %144, %146 : vector<16x16xf32>
    %cst_152 = arith.constant 0.000000e+00 : f32
    %148 = vector.broadcast %cst_152 : f32 to vector<16x16xf32>
    %149 = arith.maximumf %147, %148 : vector<16x16xf32>
    %c0_153 = arith.constant 0 : index
    %c0_154 = arith.constant 0 : index
    %c0_155 = arith.constant 0 : index
    %150 = vector.load %arg21[%c0_153, %c0_154, %c0_155] : memref<1x12x16xf32, #tpu.memory_space<vmem>>, vector<1x12x16xf32>
    %151 = vector.shape_cast %150 : vector<1x12x16xf32> to vector<12x16xf32>
    %cst_156 = arith.constant dense<0.000000e+00> : vector<16x16xf32>
    %152 = tpu.matmul %105, %151, %cst_156 {dimension_numbers = #tpu.dot_dimension_numbers<[1], [0], [0], [1], [0, 0, 1, 1], [], []>} : vector<16x12xf32>, vector<12x16xf32>, vector<16x16xf32> -> vector<16x16xf32>
    %c0_157 = arith.constant 0 : index
    %c0_158 = arith.constant 0 : index
    %153 = vector.load %arg18[%c0_157, %c0_158] : memref<1x16xf32, #tpu.memory_space<vmem>>, vector<1x16xf32>
    %154 = vector.broadcast %153 : vector<1x16xf32> to vector<16x16xf32>
    %155 = arith.addf %152, %154 : vector<16x16xf32>
    %156 = arith.addf %149, %155 : vector<16x16xf32>
    %cst_159 = arith.constant 0.000000e+00 : f32
    %157 = vector.broadcast %cst_159 : f32 to vector<16x16xf32>
    %158 = arith.maximumf %156, %157 : vector<16x16xf32>
    %c8_160 = arith.constant 8 : index
    %c0_161 = arith.constant 0 : index
    %159 = vector.load %arg27[%c8_160, %c0_161] : memref<24x16xf32, #tpu.memory_space<vmem>>, vector<16x16xf32>
    tpu.vector_store %arg27[%c8_160, %c0_161], %158 {strides = array<i32>} : memref<24x16xf32, #tpu.memory_space<vmem>>, vector<16x16xf32>,
    %cst_162 = arith.constant 0.000000e+00 : f32
    %160 = vector.broadcast %cst_162 : f32 to vector<16x16xf32>
    %c4_163 = arith.constant 4 : index
    %c0_164 = arith.constant 0 : index
    %161 = vector.load %arg27[%c4_163, %c0_164] : memref<24x16xf32, #tpu.memory_space<vmem>>, vector<16x16xf32>
    %c0_165 = arith.constant 0 : index
    %c0_166 = arith.constant 0 : index
    %c0_167 = arith.constant 0 : index
    %162 = vector.load %arg24[%c0_165, %c0_166, %c0_167] : memref<3x16x16xf32, #tpu.memory_space<vmem>>, vector<1x16x16xf32>
    %163 = vector.shape_cast %162 : vector<1x16x16xf32> to vector<16x16xf32>
    %cst_168 = arith.constant dense<0.000000e+00> : vector<16x16xf32>
    %164 = tpu.matmul %161, %163, %cst_168 {dimension_numbers = #tpu.dot_dimension_numbers<[1], [0], [0], [1], [0, 0, 1, 1], [], []>} : vector<16x16xf32>, vector<16x16xf32>, vector<16x16xf32> -> vector<16x16xf32>
    %165 = arith.addf %160, %164 : vector<16x16xf32>
    %c6_169 = arith.constant 6 : index
    %c0_170 = arith.constant 0 : index
    %166 = vector.load %arg27[%c6_169, %c0_170] : memref<24x16xf32, #tpu.memory_space<vmem>>, vector<16x16xf32>
    %c1_171 = arith.constant 1 : index
    %c0_172 = arith.constant 0 : index
    %c0_173 = arith.constant 0 : index
    %167 = vector.load %arg24[%c1_171, %c0_172, %c0_173] : memref<3x16x16xf32, #tpu.memory_space<vmem>>, vector<1x16x16xf32>
    %168 = vector.shape_cast %167 : vector<1x16x16xf32> to vector<16x16xf32>
    %cst_174 = arith.constant dense<0.000000e+00> : vector<16x16xf32>
    %169 = tpu.matmul %166, %168, %cst_174 {dimension_numbers = #tpu.dot_dimension_numbers<[1], [0], [0], [1], [0, 0, 1, 1], [], []>} : vector<16x16xf32>, vector<16x16xf32>, vector<16x16xf32> -> vector<16x16xf32>
    %170 = arith.addf %165, %169 : vector<16x16xf32>
    %c8_175 = arith.constant 8 : index
    %c0_176 = arith.constant 0 : index
    %171 = vector.load %arg27[%c8_175, %c0_176] : memref<24x16xf32, #tpu.memory_space<vmem>>, vector<16x16xf32>
    %c2_177 = arith.constant 2 : index
    %c0_178 = arith.constant 0 : index
    %c0_179 = arith.constant 0 : index
    %172 = vector.load %arg24[%c2_177, %c0_178, %c0_179] : memref<3x16x16xf32, #tpu.memory_space<vmem>>, vector<1x16x16xf32>
    %173 = vector.shape_cast %172 : vector<1x16x16xf32> to vector<16x16xf32>
    %cst_180 = arith.constant dense<0.000000e+00> : vector<16x16xf32>
    %174 = tpu.matmul %171, %173, %cst_180 {dimension_numbers = #tpu.dot_dimension_numbers<[1], [0], [0], [1], [0, 0, 1, 1], [], []>} : vector<16x16xf32>, vector<16x16xf32>, vector<16x16xf32> -> vector<16x16xf32>
    %175 = arith.addf %170, %174 : vector<16x16xf32>
    %c0_181 = arith.constant 0 : index
    %c0_182 = arith.constant 0 : index
    %176 = vector.load %arg22[%c0_181, %c0_182] : memref<1x16xf32, #tpu.memory_space<vmem>>, vector<1x16xf32>
    %177 = vector.broadcast %176 : vector<1x16xf32> to vector<16x16xf32>
    %178 = arith.addf %175, %177 : vector<16x16xf32>
    %cst_183 = arith.constant 0.000000e+00 : f32
    %179 = vector.broadcast %cst_183 : f32 to vector<16x16xf32>
    %180 = arith.maximumf %178, %179 : vector<16x16xf32>
    %c8_184 = arith.constant 8 : index
    %c0_185 = arith.constant 0 : index
    %181 = vector.load %arg27[%c8_184, %c0_185] : memref<24x16xf32, #tpu.memory_space<vmem>>, vector<16x16xf32>
    tpu.vector_store %arg27[%c8_184, %c0_185], %180 {strides = array<i32>} : memref<24x16xf32, #tpu.memory_space<vmem>>, vector<16x16xf32>,
    %cst_186 = arith.constant 0.000000e+00 : f32
    %182 = vector.broadcast %cst_186 : f32 to vector<16x16xf32>
    %c4_187 = arith.constant 4 : index
    %c0_188 = arith.constant 0 : index
    %183 = vector.load %arg27[%c4_187, %c0_188] : memref<24x16xf32, #tpu.memory_space<vmem>>, vector<16x16xf32>
    %c0_189 = arith.constant 0 : index
    %c0_190 = arith.constant 0 : index
    %c0_191 = arith.constant 0 : index
    %184 = vector.load %arg25[%c0_189, %c0_190, %c0_191] : memref<3x16x16xf32, #tpu.memory_space<vmem>>, vector<1x16x16xf32>
    %185 = vector.shape_cast %184 : vector<1x16x16xf32> to vector<16x16xf32>
    %cst_192 = arith.constant dense<0.000000e+00> : vector<16x16xf32>
    %186 = tpu.matmul %183, %185, %cst_192 {dimension_numbers = #tpu.dot_dimension_numbers<[1], [0], [0], [1], [0, 0, 1, 1], [], []>} : vector<16x16xf32>, vector<16x16xf32>, vector<16x16xf32> -> vector<16x16xf32>
    %187 = arith.addf %182, %186 : vector<16x16xf32>
    %c6_193 = arith.constant 6 : index
    %c0_194 = arith.constant 0 : index
    %188 = vector.load %arg27[%c6_193, %c0_194] : memref<24x16xf32, #tpu.memory_space<vmem>>, vector<16x16xf32>
    %c1_195 = arith.constant 1 : index
    %c0_196 = arith.constant 0 : index
    %c0_197 = arith.constant 0 : index
    %189 = vector.load %arg25[%c1_195, %c0_196, %c0_197] : memref<3x16x16xf32, #tpu.memory_space<vmem>>, vector<1x16x16xf32>
    %190 = vector.shape_cast %189 : vector<1x16x16xf32> to vector<16x16xf32>
    %cst_198 = arith.constant dense<0.000000e+00> : vector<16x16xf32>
    %191 = tpu.matmul %188, %190, %cst_198 {dimension_numbers = #tpu.dot_dimension_numbers<[1], [0], [0], [1], [0, 0, 1, 1], [], []>} : vector<16x16xf32>, vector<16x16xf32>, vector<16x16xf32> -> vector<16x16xf32>
    %192 = arith.addf %187, %191 : vector<16x16xf32>
    %c8_199 = arith.constant 8 : index
    %c0_200 = arith.constant 0 : index
    %193 = vector.load %arg27[%c8_199, %c0_200] : memref<24x16xf32, #tpu.memory_space<vmem>>, vector<16x16xf32>
    %c2_201 = arith.constant 2 : index
    %c0_202 = arith.constant 0 : index
    %c0_203 = arith.constant 0 : index
    %194 = vector.load %arg25[%c2_201, %c0_202, %c0_203] : memref<3x16x16xf32, #tpu.memory_space<vmem>>, vector<1x16x16xf32>
    %195 = vector.shape_cast %194 : vector<1x16x16xf32> to vector<16x16xf32>
    %cst_204 = arith.constant dense<0.000000e+00> : vector<16x16xf32>
    %196 = tpu.matmul %193, %195, %cst_204 {dimension_numbers = #tpu.dot_dimension_numbers<[1], [0], [0], [1], [0, 0, 1, 1], [], []>} : vector<16x16xf32>, vector<16x16xf32>, vector<16x16xf32> -> vector<16x16xf32>
    %197 = arith.addf %192, %196 : vector<16x16xf32>
    %c0_205 = arith.constant 0 : index
    %c0_206 = arith.constant 0 : index
    %198 = vector.load %arg23[%c0_205, %c0_206] : memref<1x16xf32, #tpu.memory_space<vmem>>, vector<1x16xf32>
    %199 = vector.broadcast %198 : vector<1x16xf32> to vector<16x16xf32>
    %200 = arith.addf %197, %199 : vector<16x16xf32>
    %cst_207 = arith.constant 0.000000e+00 : f32
    %201 = vector.broadcast %cst_207 : f32 to vector<16x16xf32>
    %202 = arith.maximumf %200, %201 : vector<16x16xf32>
    %203 = arith.addf %202, %158 : vector<16x16xf32>
    %cst_208 = arith.constant 0.000000e+00 : f32
    %204 = vector.broadcast %cst_208 : f32 to vector<16x16xf32>
    %205 = arith.maximumf %203, %204 : vector<16x16xf32>
    %c0_209 = arith.constant 0 : index
    %c0_210 = arith.constant 0 : index
    %206 = vector.load %arg4[%c0_209, %c0_210] : memref<16x5xf32, #tpu.memory_space<vmem>>, vector<16x5xf32>
    %cst_211 = arith.constant dense<0.000000e+00> : vector<16x5xf32>
    %207 = tpu.matmul %103, %206, %cst_211 {dimension_numbers = #tpu.dot_dimension_numbers<[1], [0], [0], [1], [0, 0, 1, 1], [], []>} : vector<16x16xf32>, vector<16x5xf32>, vector<16x5xf32> -> vector<16x5xf32>
    %c0_212 = arith.constant 0 : index
    %c0_213 = arith.constant 0 : index
    %208 = vector.load %arg5[%c0_212, %c0_213] : memref<16x5xf32, #tpu.memory_space<vmem>>, vector<16x5xf32>
    %cst_214 = arith.constant dense<0.000000e+00> : vector<16x5xf32>
    %209 = tpu.matmul %205, %208, %cst_214 {dimension_numbers = #tpu.dot_dimension_numbers<[1], [0], [0], [1], [0, 0, 1, 1], [], []>} : vector<16x16xf32>, vector<16x5xf32>, vector<16x5xf32> -> vector<16x5xf32>
    %210 = arith.addf %207, %209 : vector<16x5xf32>
    %c0_215 = arith.constant 0 : index
    %c0_216 = arith.constant 0 : index
    %211 = vector.load %arg3[%c0_215, %c0_216] : memref<1x5xf32, #tpu.memory_space<vmem>>, vector<1x5xf32>
    %212 = vector.broadcast %211 : vector<1x5xf32> to vector<16x5xf32>
    %213 = arith.addf %210, %212 : vector<16x5xf32>
    %cst_217 = arith.constant dense<0xFF800000> : vector<16xf32>
    %214 = vector.multi_reduction <maximumf>, %213, %cst_217 [1] : vector<16x5xf32> to vector<16xf32>
    %215 = vector.shape_cast %214 : vector<16xf32> to vector<16x1xf32>
    %216 = vector.broadcast %215 : vector<16x1xf32> to vector<16x5xf32>
    %217 = arith.subf %213, %216 : vector<16x5xf32>
    %218 = math.exp %217 : vector<16x5xf32>
    %cst_218 = arith.constant dense<0.000000e+00> : vector<16xf32>
    %219 = vector.multi_reduction <add>, %218, %cst_218 [1] : vector<16x5xf32> to vector<16xf32>
    %220 = vector.shape_cast %219 : vector<16xf32> to vector<16x1xf32>
    %221 = tpu.reciprocal %220 : vector<16x1xf32> -> vector<16x1xf32>
    %222 = vector.broadcast %221 : vector<16x1xf32> to vector<16x5xf32>
    %223 = arith.mulf %218, %222 : vector<16x5xf32>
    %c0_219 = arith.constant 0 : index
    %c0_220 = arith.constant 0 : index
    %c0_221 = arith.constant 0 : index
    %224 = vector.load %arg26[%c0_219, %c0_220, %c0_221] : memref<1x16x5xf32, #tpu.memory_space<vmem>>, vector<1x16x5xf32>
    %225 = vector.shape_cast %224 : vector<1x16x5xf32> to vector<16x5xf32>
    %226 = vector.shape_cast %223 : vector<16x5xf32> to vector<1x16x5xf32>
    tpu.vector_store %arg26[%c0_219, %c0_220, %c0_221], %226 {strides = array<i32>} : memref<1x16x5xf32, #tpu.memory_space<vmem>>, vector<1x16x5xf32>,
    return
  }
  func.func @transform_0(%arg0: i32) -> (i32, i32, i32) {
    %c0_i32 = arith.constant 0 : i32
    %c0_i32_0 = arith.constant 0 : i32
    %c0_i32_1 = arith.constant 0 : i32
    return %arg0, %c0_i32, %c0_i32_0 : i32, i32, i32
  }
  func.func @transform_1(%arg0: i32) -> (i32, i32, i32) {
    %c0_i32 = arith.constant 0 : i32
    %c0_i32_0 = arith.constant 0 : i32
    %c0_i32_1 = arith.constant 0 : i32
    return %arg0, %c0_i32, %c0_i32_0 : i32, i32, i32
  }
  func.func @transform_2(%arg0: i32) -> (i32, i32) {
    %c0_i32 = arith.constant 0 : i32
    %c0_i32_0 = arith.constant 0 : i32
    %c0_i32_1 = arith.constant 0 : i32
    return %c0_i32, %c0_i32_0 : i32, i32
  }
  func.func @transform_3(%arg0: i32) -> (i32, i32) {
    %c0_i32 = arith.constant 0 : i32
    %c0_i32_0 = arith.constant 0 : i32
    %c0_i32_1 = arith.constant 0 : i32
    return %c0_i32, %c0_i32_0 : i32, i32
  }
  func.func @transform_4(%arg0: i32) -> (i32, i32) {
    %c0_i32 = arith.constant 0 : i32
    %c0_i32_0 = arith.constant 0 : i32
    %c0_i32_1 = arith.constant 0 : i32
    return %c0_i32, %c0_i32_0 : i32, i32
  }
  func.func @transform_5(%arg0: i32) -> (i32, i32) {
    %c0_i32 = arith.constant 0 : i32
    %c0_i32_0 = arith.constant 0 : i32
    %c0_i32_1 = arith.constant 0 : i32
    return %c0_i32, %c0_i32_0 : i32, i32
  }
  func.func @transform_6(%arg0: i32) -> (i32, i32) {
    %c0_i32 = arith.constant 0 : i32
    %c0_i32_0 = arith.constant 0 : i32
    %c0_i32_1 = arith.constant 0 : i32
    return %c0_i32, %c0_i32_0 : i32, i32
  }
  func.func @transform_7(%arg0: i32) -> (i32, i32) {
    %c0_i32 = arith.constant 0 : i32
    %c0_i32_0 = arith.constant 0 : i32
    %c0_i32_1 = arith.constant 0 : i32
    return %c0_i32, %c0_i32_0 : i32, i32
  }
  func.func @transform_8(%arg0: i32) -> (i32, i32, i32) {
    %c0_i32 = arith.constant 0 : i32
    %c0_i32_0 = arith.constant 0 : i32
    %c0_i32_1 = arith.constant 0 : i32
    %c0_i32_2 = arith.constant 0 : i32
    return %c0_i32, %c0_i32_0, %c0_i32_1 : i32, i32, i32
  }
  func.func @transform_9(%arg0: i32) -> (i32, i32, i32) {
    %c0_i32 = arith.constant 0 : i32
    %c0_i32_0 = arith.constant 0 : i32
    %c0_i32_1 = arith.constant 0 : i32
    %c0_i32_2 = arith.constant 0 : i32
    return %c0_i32, %c0_i32_0, %c0_i32_1 : i32, i32, i32
  }
  func.func @transform_10(%arg0: i32) -> (i32, i32, i32) {
    %c0_i32 = arith.constant 0 : i32
    %c0_i32_0 = arith.constant 0 : i32
    %c0_i32_1 = arith.constant 0 : i32
    %c0_i32_2 = arith.constant 0 : i32
    return %c0_i32, %c0_i32_0, %c0_i32_1 : i32, i32, i32
  }
  func.func @transform_11(%arg0: i32) -> (i32, i32) {
    %c0_i32 = arith.constant 0 : i32
    %c0_i32_0 = arith.constant 0 : i32
    %c0_i32_1 = arith.constant 0 : i32
    return %c0_i32, %c0_i32_0 : i32, i32
  }
  func.func @transform_12(%arg0: i32) -> (i32, i32) {
    %c0_i32 = arith.constant 0 : i32
    %c0_i32_0 = arith.constant 0 : i32
    %c0_i32_1 = arith.constant 0 : i32
    return %c0_i32, %c0_i32_0 : i32, i32
  }
  func.func @transform_13(%arg0: i32) -> (i32, i32, i32) {
    %c0_i32 = arith.constant 0 : i32
    %c0_i32_0 = arith.constant 0 : i32
    %c0_i32_1 = arith.constant 0 : i32
    %c0_i32_2 = arith.constant 0 : i32
    return %c0_i32, %c0_i32_0, %c0_i32_1 : i32, i32, i32
  }
  func.func @transform_14(%arg0: i32) -> (i32, i32, i32) {
    %c0_i32 = arith.constant 0 : i32
    %c0_i32_0 = arith.constant 0 : i32
    %c0_i32_1 = arith.constant 0 : i32
    %c0_i32_2 = arith.constant 0 : i32
    return %c0_i32, %c0_i32_0, %c0_i32_1 : i32, i32, i32
  }
  func.func @transform_15(%arg0: i32) -> (i32, i32) {
    %c0_i32 = arith.constant 0 : i32
    %c0_i32_0 = arith.constant 0 : i32
    %c0_i32_1 = arith.constant 0 : i32
    return %c0_i32, %c0_i32_0 : i32, i32
  }
  func.func @transform_16(%arg0: i32) -> (i32, i32) {
    %c0_i32 = arith.constant 0 : i32
    %c0_i32_0 = arith.constant 0 : i32
    %c0_i32_1 = arith.constant 0 : i32
    return %c0_i32, %c0_i32_0 : i32, i32
  }
  func.func @transform_17(%arg0: i32) -> (i32, i32) {
    %c0_i32 = arith.constant 0 : i32
    %c0_i32_0 = arith.constant 0 : i32
    %c0_i32_1 = arith.constant 0 : i32
    return %c0_i32, %c0_i32_0 : i32, i32
  }
  func.func @transform_18(%arg0: i32) -> (i32, i32, i32) {
    %c0_i32 = arith.constant 0 : i32
    %c0_i32_0 = arith.constant 0 : i32
    %c0_i32_1 = arith.constant 0 : i32
    %c0_i32_2 = arith.constant 0 : i32
    return %c0_i32, %c0_i32_0, %c0_i32_1 : i32, i32, i32
  }
  func.func @transform_19(%arg0: i32) -> (i32, i32, i32) {
    %c0_i32 = arith.constant 0 : i32
    %c0_i32_0 = arith.constant 0 : i32
    %c0_i32_1 = arith.constant 0 : i32
    %c0_i32_2 = arith.constant 0 : i32
    return %c0_i32, %c0_i32_0, %c0_i32_1 : i32, i32, i32
  }
  func.func @transform_20(%arg0: i32) -> (i32, i32, i32) {
    %c0_i32 = arith.constant 0 : i32
    %c0_i32_0 = arith.constant 0 : i32
    %c0_i32_1 = arith.constant 0 : i32
    %c0_i32_2 = arith.constant 0 : i32
    return %c0_i32, %c0_i32_0, %c0_i32_1 : i32, i32, i32
  }
  func.func @transform_21(%arg0: i32) -> (i32, i32) {
    %c0_i32 = arith.constant 0 : i32
    %c0_i32_0 = arith.constant 0 : i32
    %c0_i32_1 = arith.constant 0 : i32
    return %c0_i32, %c0_i32_0 : i32, i32
  }
  func.func @transform_22(%arg0: i32) -> (i32, i32) {
    %c0_i32 = arith.constant 0 : i32
    %c0_i32_0 = arith.constant 0 : i32
    %c0_i32_1 = arith.constant 0 : i32
    return %c0_i32, %c0_i32_0 : i32, i32
  }
  func.func @transform_23(%arg0: i32) -> (i32, i32, i32) {
    %c0_i32 = arith.constant 0 : i32
    %c0_i32_0 = arith.constant 0 : i32
    %c0_i32_1 = arith.constant 0 : i32
    %c0_i32_2 = arith.constant 0 : i32
    return %c0_i32, %c0_i32_0, %c0_i32_1 : i32, i32, i32
  }
  func.func @transform_24(%arg0: i32) -> (i32, i32, i32) {
    %c0_i32 = arith.constant 0 : i32
    %c0_i32_0 = arith.constant 0 : i32
    %c0_i32_1 = arith.constant 0 : i32
    %c0_i32_2 = arith.constant 0 : i32
    return %c0_i32, %c0_i32_0, %c0_i32_1 : i32, i32, i32
  }
  func.func @transform_25(%arg0: i32) -> (i32, i32, i32) {
    %c0_i32 = arith.constant 0 : i32
    %c0_i32_0 = arith.constant 0 : i32
    %c0_i32_1 = arith.constant 0 : i32
    return %arg0, %c0_i32, %c0_i32_0 : i32, i32, i32
  }
}

</mosaic_0001>

<bundles_post_ra>
// kernel: tpu_custom_call.1
= control target key start
LH: loop header
LB: loop body
LE: loop exit
PB: predicated region body
PF: predicated region fallthrough
CT: control target
= control target key end

     0   :  { %s2957_s0 = inlined_call_operand.vmem [shape: f32[2,16,8], index: 0, kind: input, shape index: {}]   ;;  %s2958_s1 = inlined_call_operand.vmem [shape: f32[2,16,12], index: 1, kind: input, shape index: {}]   ;;  %s2959_s2 = inlined_call_operand.vmem [shape: f32[1,5], index: 2, kind: input, shape index: {}]   ;;  %s2960_s3 = inlined_call_operand.vmem [shape: f32[16,5], index: 3, kind: input, shape index: {}]   ;;  %s2961_s4 = inlined_call_operand.vmem [shape: f32[16,5], index: 4, kind: input, shape index: {}]   ;;  %s2962_s5 = inlined_call_operand.vmem [shape: f32[1,16], index: 5, kind: input, shape index: {}]   ;;  %s2963_s6 = inlined_call_operand.vmem [shape: f32[1,16], index: 6, kind: input, shape index: {}]   ;;  %s2964_s7 = inlined_call_operand.vmem [shape: f32[1,16], index: 7, kind: input, shape index: {}]   ;;  %s2965_s8 = inlined_call_operand.vmem [shape: f32[3,8,16], index: 8, kind: input, shape index: {}]   ;;  %s2966_s9 = inlined_call_operand.vmem [shape: f32[3,16,16], index: 9, kind: input, shape index: {}]   ;;  %s2967_s10 = inlined_call_operand.vmem [shape: f32[1,8,16], index: 10, kind: input, shape index: {}]   ;;  %s2968_s11 = inlined_call_operand.vmem [shape: f32[1,16], index: 11, kind: input, shape index: {}]   ;;  %s2969_s12 = inlined_call_operand.vmem [shape: f32[1,16], index: 12, kind: input, shape index: {}]   ;;  %s2970_s13 = inlined_call_operand.hbm [shape: f32[3,16,16], index: 13, kind: input, shape index: {}]   ;;  %s2971_s14 = inlined_call_operand.hbm [shape: f32[3,16,16], index: 14, kind: input, shape index: {}]   ;;  %s2972_s15 = inlined_call_operand.vmem [shape: f32[1,16], index: 15, kind: input, shape index: {}]   ;;  %s2973_s16 = inlined_call_operand.vmem [shape: f32[1,16], index: 16, kind: input, shape index: {}]   ;;  %s2974_s17 = inlined_call_operand.vmem [shape: f32[1,16], index: 17, kind: input, shape index: {}]   ;;  %s2975_s18 = inlined_call_operand.hbm [shape: f32[3,12,16], index: 18, kind: input, shape index: {}]   ;;  %s2976_s19 = inlined_call_operand.hbm [shape: f32[3,16,16], index: 19, kind: input, shape index: {}]   ;;  %s2977_s20 = inlined_call_operand.vmem [shape: f32[1,12,16], index: 20, kind: input, shape index: {}]   ;;  %s2978_s21 = inlined_call_operand.vmem [shape: f32[1,16], index: 21, kind: input, shape index: {}]   ;;  %s2979_s22 = inlined_call_operand.vmem [shape: f32[1,16], index: 22, kind: input, shape index: {}]   ;;  %s2980_s23 = inlined_call_operand.hbm [shape: f32[3,16,16], index: 23, kind: input, shape index: {}]   ;;  %s2981_s24 = inlined_call_operand.hbm [shape: f32[3,16,16], index: 24, kind: input, shape index: {}]   ;;  %s2982_s25 = inlined_call_operand.vmem [shape: f32[2,16,5], index: 25, kind: output, shape index: {}]  }
   0x1   :  { %2988 = sst [smem:[#allocation18_spill]] %s2957_s0 }
   0x2   :  { %2989 = sst [smem:[#allocation19_spill]] %s2958_s1 }
   0x3   :  { %2990 = sst [smem:[#allocation20_spill]] %s2959_s2 }
   0x4   :  { %2991 = sst [smem:[#allocation21_spill]] %s2960_s3 }
   0x5   :  { %2992 = sst [smem:[#allocation22_spill]] %s2961_s4 }
   0x6   :  { %2993 = sst [smem:[#allocation23_spill]] %s2962_s5 }
   0x7   :  { %2994 = sst [smem:[#allocation24_spill]] %s2963_s6 }
   0x8   :  { %2995 = sst [smem:[#allocation25_spill]] %s2964_s7 }
   0x9   :  { %2996 = sst [smem:[#allocation26_spill]] %s2965_s8 }
   0xa   :  { %2997 = sst [smem:[#allocation27_spill]] %s2966_s9 }
   0xb   :  { %2998 = sst [smem:[#allocation28_spill]] %s2970_s13 }
   0xc   :  { %2999 = sst [smem:[#allocation29_spill]] %s2971_s14 }
   0xd   :  { %3000 = sst [smem:[#allocation30_spill]] %s2976_s19 }
   0xe   :  { %30 = vsyncpa [#allocation4], 0 }
   0xf   :  { %31 = vsyncpa [#allocation6], 0 }
  0x10   :  { %32 = vsyncpa [#allocation9], 0 }
  0x11   :  { %33 = vsyncpa [#allocation12], 0  ;;  %s2666_s29 = smov 0  }
  0x12 LB: > { %3001 = sst [smem:[#allocation17_spill]] %s2525_s29  ;;  %s2672_s2 = sadd.s32 4294967295, %s2525_s29   ;;  %s2525_s29 = sphi %s2666_s29, %s39_s29  }
  0x13   : > { %p2140_p0 = scmp.ge.s32.totalorder %s2525_s29, 1  ;;  %p605_p1 = scmp.lt.s32.totalorder %s2525_s29, 3 }
  0x14   : > { %p2275_p2 = scmp.eq.s32.totalorder %s2672_s2, 0  ;;  %s3002_s14 = sld [smem:[#allocation29_spill]] }
  0x15   : > { %p2680_p3 = pnand %p2140_p0, %p605_p1  ;;  %s3004_s19 = sld [smem:[#allocation30_spill]] }
  0x16   : > { %s2527_s27 = smov [#allocation5]   ;;  %s2528_s9 = smov [#allocation8]  }
  0x17   : > { %p2256_p4 = pneg %p2680_p3  ;;  %s665_s4 = sshll.u32 %s2527_s27, 4  ;;  %s666_s4 = int_to_ptr.vmem [resolvable:$true] %s665_s4 }
  0x18   : > { %s702_s5 = sshll.u32 %s2528_s9, 4  ;;  %s3006_s13 = sld [smem:[#allocation28_spill]]  ;;  %s703_s5 = int_to_ptr.vmem [resolvable:$true] %s702_s5 }
  0x19   : > { %p2691_p5 = pnand %p2275_p2, %p2256_p4  ;;  %s2529_s26 = smov 128  }
  0x1a   : > { %s663_s7 = sshll.u32 %s3002_s14, 4  ;;  %s2530_s1 = smov 8   ;;  %s664_s7 = int_to_ptr.hbm [resolvable:$true] %s663_s7 }
  0x1b   : > { %s700_s8 = sshll.u32 %s3004_s19, 4  ;;  %s2531_s27 = smov [#allocation3]   ;;  %s701_s8 = int_to_ptr.hbm [resolvable:$true] %s700_s8 }
  0x1c   : > { %2262 = dma.hbm_to_vmem [thread:$0]  (!%p2691_p5), %s664_s7, 768, %s666_s4, [#allocation6], %s2529_s26, %s2529_s26, %s2530_s1  }
  0x1d   : > { %2268 = dma.hbm_to_vmem [thread:$0]  (!%p2691_p5), %s701_s8, 768, %s703_s5, [#allocation9], %s2529_s26, %s2529_s26, %s2530_s1  }
  0x1e   : > { %s649_s30 = sshll.u32 %s3006_s13, 4  ;;  %s651_s14 = sshll.u32 %s2531_s27, 4  ;;  %s650_s30 = int_to_ptr.hbm [resolvable:$true] %s649_s30  ;;  %s652_s14 = int_to_ptr.vmem [resolvable:$true] %s651_s14 }
  0x1f   : > { %s686_s9 = sshll.u32 %s2975_s18, 4  ;;  %s723_s13 = sshll.u32 %s2980_s23, 4  ;;  %s687_s9 = int_to_ptr.hbm [resolvable:$true] %s686_s9  ;;  %s724_s13 = int_to_ptr.hbm [resolvable:$true] %s723_s13 }
  0x20   : > { %2259 = dma.hbm_to_vmem [thread:$0]  (!%p2691_p5), %s650_s30, 768, %s652_s14, [#allocation4], %s2529_s26, %s2529_s26, %s2530_s1  }
  0x21   : > { %s2532_s7 = smov [#allocation7]   ;;  %s2533_s8 = smov [#allocation10]  }
  0x22   : > { %s688_s4 = sshll.u32 %s2532_s7, 4  ;;  %s725_s5 = sshll.u32 %s2533_s8, 4  ;;  %s689_s4 = int_to_ptr.vmem [resolvable:$true] %s688_s4  ;;  %s726_s5 = int_to_ptr.vmem [resolvable:$true] %s725_s5 }
  0x23   : > { %2265 = dma.hbm_to_vmem [thread:$0]  (!%p2691_p5), %s687_s9, 768, %s689_s4, [#allocation6], %s2529_s26, %s2529_s26, %s2530_s1  }
  0x24   : > { %s737_s29 = sshll.u32 %s2981_s24, 4  ;;  %s2534_s14 = smov [#allocation11]   ;;  %s738_s29 = int_to_ptr.hbm [resolvable:$true] %s737_s29 }
  0x25   : > { %2271 = dma.hbm_to_vmem [thread:$0]  (!%p2691_p5), %s724_s13, 768, %s726_s5, [#allocation9], %s2529_s26, %s2529_s26, %s2530_s1  }
  0x26   : > { %s739_s30 = sshll.u32 %s2534_s14, 4  ;;  %771 = sbr.rel (%p2680_p3) target bundleno = 1530 (0x5fa), region = 120  ;;  %s740_s30 = int_to_ptr.vmem [resolvable:$true] %s739_s30 }
  0x27   : > { %2274 = dma.hbm_to_vmem [thread:$0]  (!%p2691_p5), %s738_s29, 768, %s740_s30, [#allocation12], %s2529_s26, %s2529_s26, %s2530_s1  }
  0x2b   : > { %2508 = dma.done.wait (%p2275_p2), [#allocation4], 768  }
  0x2c   : > { %2510 = vsyncadd (%p2275_p2), [#allocation4], 4294966528 }
  0x2d   : > { %2512 = dma.done.wait (%p2275_p2), [#allocation6], 1536  }
  0x2e   : > { %2514 = vsyncadd (%p2275_p2), [#allocation6], 4294965760 }
  0x2f   : > { %2516 = dma.done.wait (%p2275_p2), [#allocation9], 1536  }
  0x30   : > { %2518 = vsyncadd (%p2275_p2), [#allocation9], 4294965760 }
  0x31   : > { %2520 = dma.done.wait (%p2275_p2), [#allocation12], 768  }
  0x32   : > { %2522 = vsyncadd (%p2275_p2), [#allocation12], 4294966528  ;;  %p870_p6 = scmp.lt.s32.totalorder %s2672_s2, 1  ;;  %vm885_vm0 = vcmask 130048   ;;  %v2535_v0 = vmov 0.0   ;;  %s3007_s26 = sld [smem:[#allocation18_spill]] }
  0x33   : > { %886 = vst.msk [vmem:[#allocation2] sm:$0xff] %vm885_vm0, %v2535_v0  ;;  %vm889_vm1 = vcmask 64512   ;;  %s3008_s6 = sld [smem:[#allocation26_spill]]  ;;  %v1113_v13 = vld [vmem:[%s2967_s10] sm:$0xff]  ;;  %v1161_v40 = vld [vmem:[#allocation3 + $0x18] sm:$0xff]  ;;  %v1160_v42 = vld [vmem:[#allocation3 + $0x10] sm:$0xff] }
  0x34   : > { %s3019_s2 = smov (!%p870_p6, %s2672_s2), 1  ;;  %s3009_s19 = sld [smem:[#allocation27_spill]]  ;;  %v1156_v41 = vld [vmem:[#allocation3 + $0x8] sm:$0xff]  ;;  %v1155_v44 = vld [vmem:[#allocation3] sm:$0xff]  ;;  %vm1401_vm2 = vcmask 1043456   ;;  %vm1383_vm3 = vcmask 97280  }
  0x35   : > { %s2740_s13 = sshll.u32 %s3019_s2, 4  ;;  %s3010_s27 = sld [smem:[#allocation23_spill]]  ;;  %v1224_v43 = vld [vmem:[#allocation3 + $0x28] sm:$0xff]  ;;  %v1223_v45 = vld [vmem:[#allocation3 + $0x20] sm:$0xff]  ;;  %vm1960_vm4 = vcmask 39936  }
  0x36   : > { %s3011_s30 = sld [smem:[#allocation24_spill]] }
  0x37   : > { %s3013_s4 = sld [smem:[#allocation19_spill]] }
  0x38   : > { %s874_s1 = scalar_lea.vmem %s3007_s26, %s2740_s13  ;;  %s3012_s26 = sld [smem:[#allocation25_spill]] }
  0x39   : > { %v2166_v1 = vld [vmem:[%s3008_s6 + $0x10] sm:$0xff]  ;;  %v887_v2 = vld [vmem:[%s874_s1] sm:$0xff]  ;;  %v2161_v3 = vld [vmem:[%s3008_s6 + $0x8] sm:$0xff]  ;;  %s3014_s7 = sld [smem:[#allocation21_spill]] }
  0x3a   : > { %982 = vmatpush.msra.mxu2 %v2166_v1  ;;  %890 = vst.msk [vmem:[#allocation2 + $0x8] sm:$0xff] %vm889_vm1, %v887_v2  ;;  %v894_v4 = vld [vmem:[%s3008_s6] sm:$0xff]  ;;  %920 = vmatpush.msra.mxu0 %v2161_v3  ;;  %v888_v5 = vld [vmem:[%s874_s1 + $0x8] sm:$0xff]  ;;  %v2170_v15 = vld [vmem:[%s3009_s19 + $0x18] sm:$0xff]  ;;  %s3015_s3 = sld [smem:[#allocation22_spill]] }
  0x3b   : > { %949 = vmatpush.msra.mxu1 %v894_v4  ;;  %891 = vst.msk [vmem:[#allocation2 + $0x10] sm:$0xff] %vm889_vm1, %v888_v5  ;;  %v1005_v12 = vld [vmem:[%s3009_s19 + $0x8] sm:$0xff]  ;;  %1031 = vmatpush.msra.mxu3 %v2170_v15  ;;  %v1004_v16 = vld [vmem:[%s3009_s19] sm:$0xff]  ;;  %v2169_v17 = vld [vmem:[%s3009_s19 + $0x10] sm:$0xff] }
  0x3c   : > { %v2176_v14 = vld [vmem:[%s3009_s19 + $0x28] sm:$0xff]  ;;  %1060 = vmatpush.msrb.mxu0 %v1005_v12  ;;  %1139 = vmatpush.msrb.mxu2 %v1113_v13  ;;  %v2175_v18 = vld [vmem:[%s3009_s19 + $0x20] sm:$0xff]  ;;  %v1269_v13 = vld [vmem:[#allocation5 + $0x8] sm:$0xff] }
  0x3d   : > { %1094 = vmatpush.msrb.mxu1 %v2176_v14  ;;  %1032 = vmatpush.msra.mxu3 %v2169_v17  ;;  %v2304_v22 = vld [vmem:[%s3010_s27] ss:$0 sm:$0xff]  ;;  %v1337_v14 = vld [vmem:[#allocation5 + $0x28] sm:$0xff]  ;;  %v1273_v15 = vld [vmem:[#allocation5 + $0x10] sm:$0xff]  ;;  %s879_s2 = scalar_lea.vmem %s3013_s4, %s2740_s13  ;;  %s884_s27 = scalar_lea.vmem %s2982_s25, %s2740_s13 }
  0x3e   : > { %1061 = vmatpush.msrb.mxu0 %v1004_v16  ;;  %v2305_v51 = vld [vmem:[%s3011_s30] ss:$0 sm:$0xff]  ;;  %v1268_v16 = vld [vmem:[#allocation5] sm:$0xff] }
  0x3f   : > { %1095 = vmatpush.msrb.mxu1 %v2175_v18  ;;  %1182 = vmatpush.msrb.mxu3 %v1161_v40  ;;  %v2306_v52 = vld [vmem:[%s3012_s26] ss:$0 sm:$0xff]  ;;  %v1336_v17 = vld [vmem:[#allocation5 + $0x20] sm:$0xff] }
  0x40   : > { %v1274_v12 = vld [vmem:[#allocation5 + $0x18] sm:$0xff] }
  0x41   : > { %v957_v6 = vld [vmem:[#allocation2 + $0x8] sm:$0xff]  ;;  %1183 = vmatpush.msrb.mxu3 %v1160_v42  ;;  %v1389_v18 = vld [vmem:[#allocation7 + $0x8] sm:$0xf] }
  0x42   : > { %v895_v7 = vld [vmem:[#allocation2 + $0x7] sm:$0xff]  ;;  %2167 = vmatmul.msk.f32.vlgmr.msra.gmra.mxu2 %vm889_vm1, %v957_v6  ;;  %v958_v9 = vld [vmem:[#allocation2 + $0x10] sm:$0xff] }
  0x43   : > { %v892_v8 = vld [vmem:[#allocation2 + $0x6] sm:$0xff]  ;;  %2162 = vmatmul.msk.f32.vlgmr.msra.gmra.mxu0 %vm889_vm1, %v895_v7  ;;  %v896_v10 = vld [vmem:[#allocation2 + $0xf] sm:$0xff]  ;;  %1295 = vmatpush.msra.mxu2 %v1274_v12 }
  0x44   : > { %2164 = vmatmul.msk.f32.vlgmr.msra.gmra.mxu1 %vm889_vm1, %v892_v8  ;;  %v893_v11 = vld [vmem:[#allocation2 + $0xe] sm:$0xff]  ;;  %1211 = vmatpush.msra.mxu0 %v1156_v41  ;;  %v1381_v42 = vld [vmem:[%s879_s2] sm:$0xff] }
  0x45   : > { %1245 = vmatpush.msra.mxu1 %v1224_v43  ;;  %1296 = vmatpush.msra.mxu2 %v1273_v15  ;;  %v1382_v43 = vld [vmem:[%s879_s2 + $0x8] sm:$0xff]  ;;  %s3016_s2 = sld [smem:[#allocation20_spill]] }
  0x46   : > { %1212 = vmatpush.msra.mxu0 %v1155_v44 }
  0x47   : > { %1246 = vmatpush.msra.mxu1 %v1223_v45 }
  0x4a   : > { %2168 = vmatmul.msk.f32.gmra.mxu2 %vm889_vm1, %v958_v9 }
  0x4b   : > { %2163 = vmatmul.msk.f32.gmra.mxu0 %vm889_vm1, %v896_v10 }
  0x4c   : > { %2165 = vmatmul.msk.f32.gmra.mxu1 %vm889_vm1, %v893_v11 }
  0x52   : > { %2179 = vmatmul.msk.f32.vlgmr.msrb.gmra.mxu2 %vm889_vm1, %v887_v2 }
  0x53   : > { %2196 = vmatpush.msk.msrb.mxu2 %vm1401_vm2, %v1389_v18 }
  0x5a   : > { %2180 = vmatmul.msk.f32.gmra.mxu2 %vm889_vm1, %v888_v5 }
  0xc0   : > { %v922_v19 = vpop.f32.mrf.mxu0 }
  0xc1   : > { %v951_v20 = vpop.f32.mrf.mxu1 }
  0xc2   : > { %v952_v21 = vadd.f32 %v951_v20, %v922_v19  ;;  %v1464_v19 = vld [vmem:[#allocation7 + $0x28] sm:$0xf]  ;;  %v1394_v20 = vld [vmem:[#allocation7 + $0x18] sm:$0xf] }
  0xc5   : > { %v984_v23 = vpop.f32.mrf.mxu2 }
  0xc6   : > { %v990_v24 = vadd.f32 %v984_v23, %v952_v21  ;;  %v1388_v21 = vld [vmem:[#allocation7] sm:$0xff]  ;;  %v1393_v23 = vld [vmem:[#allocation7 + $0x10] sm:$0xff] }
  0xc7   : > { %1452 = vmatpush.msrb.mxu2 %v1388_v21 }
  0xc8   : > { %v925_v25 = vpop.f32.mrf.mxu0  ;;  %v996_v26 = vadd.f32 %v2304_v22, %v990_v24 }
  0xc9   : > { %v954_v27 = vpop.f32.mrf.mxu1 }
  0xca   : > { %v998_v28 = vmax.f32 %v996_v26, 0.0  ;;  %v955_v29 = vadd.f32 %v954_v27, %v925_v25 }
  0xcc   : > { %1000 = vst.msk [vmem:[#allocation2 + $0x8] sm:$0xff] %vm885_vm0, %v998_v28  ;;  %v2307_v28 = vld [vmem:[%s2968_s11] ss:$0 sm:$0xff] }
  0xcd   : > { %v987_v30 = vpop.f32.mrf.mxu2 }
  0xce   : > { %v991_v31 = vadd.f32 %v987_v30, %v955_v29 }
  0xd0   : > { %v997_v32 = vadd.f32 %v2304_v22, %v991_v31  ;;  %v1463_v22 = vld [vmem:[#allocation7 + $0x20] sm:$0xff] }
  0xd2   : > { %v999_v33 = vmax.f32 %v997_v32, 0.0 }
  0xd3   : > { %v1006_v34 = vld [vmem:[#allocation2 + $0x7] sm:$0xff] }
  0xd4   : > { %v1002_v35 = vld [vmem:[#allocation2 + $0x6] sm:$0xff]  ;;  %1001 = vst.msk [vmem:[#allocation2 + $0x10] sm:$0xff] %vm885_vm0, %v999_v33  ;;  %2171 = vmatmul.msk.f32.vlgmr.msra.gmra.mxu3 %vm885_vm0, %v1006_v34 }
  0xd5   : > { %v1069_v36 = vld [vmem:[#allocation2 + $0x8] sm:$0xff]  ;;  %2173 = vmatmul.msk.f32.vlgmr.msrb.gmra.mxu0 %vm885_vm0, %v1002_v35  ;;  %v1141_v47 = vpop.f32.mrf.mxu2  ;;  %1324 = vmatpush.msra.mxu3 %v1269_v13  ;;  %v2309_v13 = vld [vmem:[%s2972_s15] ss:$0 sm:$0xff] }
  0xd6   : > { %2177 = vmatmul.msk.f32.vlgmr.msrb.gmra.mxu1 %vm885_vm0, %v1069_v36  ;;  %v1142_v55 = vadd.f32 %v2306_v52, %v1141_v47  ;;  %1358 = vmatpush.msrb.mxu0 %v1337_v14 }
  0xd7   : > { %1325 = vmatpush.msra.mxu3 %v1268_v16  ;;  %2193 = vmatpush.msk.msrb.mxu1 %vm1401_vm2, %v1394_v20 }
  0xd8   : > { %1359 = vmatpush.msrb.mxu0 %v1336_v17 }
  0xd9   : > { %1420 = vmatpush.msrb.mxu1 %v1393_v23 }
  0xdb   : > { %v1007_v37 = vld [vmem:[#allocation2 + $0xf] sm:$0xff] }
  0xdc   : > { %v1003_v38 = vld [vmem:[#allocation2 + $0xe] sm:$0xff]  ;;  %2172 = vmatmul.msk.f32.gmra.mxu3 %vm885_vm0, %v1007_v37 }
  0xdd   : > { %v1070_v39 = vld [vmem:[#allocation2 + $0x10] sm:$0xff]  ;;  %2174 = vmatmul.msk.f32.gmra.mxu0 %vm885_vm0, %v1003_v38  ;;  %v1144_v62 = vpop.f32.mrf.mxu2 }
  0xde   : > { %2178 = vmatmul.msk.f32.gmra.mxu1 %vm885_vm0, %v1070_v39  ;;  %v1145_v2 = vadd.f32 %v2306_v52, %v1144_v62  ;;  %v1511_v62 = vld [vmem:[#allocation8] sm:$0xff] }
 0x152   : > { %v1063_v46 = vpop.f32.mrf.mxu0 }
 0x153   : > { %v1097_v48 = vpop.f32.mrf.mxu1 }
 0x157   : > { %v1034_v49 = vpop.f32.mrf.mxu3 }
 0x158   : > { %v1064_v50 = vadd.f32 %v1063_v46, %v1034_v49 }
 0x15a   : > { %v1103_v53 = vadd.f32 %v1097_v48, %v1064_v50  ;;  %v1066_v57 = vpop.f32.mrf.mxu0 }
 0x15b   : > { %v1100_v61 = vpop.f32.mrf.mxu1 }
 0x15c   : > { %v1109_v54 = vadd.f32 %v2305_v51, %v1103_v53  ;;  %v1580_v53 = vld [vmem:[#allocation8 + $0x28] sm:$0xff] }
 0x15e   : > { %v1111_v56 = vmax.f32 %v1109_v54, 0.0  ;;  %v1517_v54 = vld [vmem:[#allocation8 + $0x18] sm:$0xff] }
 0x15f   : > { %v1037_v58 = vpop.f32.mrf.mxu3 }
 0x160   : > { %v2803_v59 = vadd.f32 %v1142_v55, %v1111_v56  ;;  %v1067_v60 = vadd.f32 %v1066_v57, %v1037_v58  ;;  %v1512_v55 = vld [vmem:[#allocation8 + $0x8] sm:$0xff]  ;;  %v1621_v56 = vld [vmem:[%s2977_s20 + $0x8] sm:$0xf] }
 0x161   : > { %v1579_v57 = vld [vmem:[#allocation8 + $0x20] sm:$0xff] }
 0x162   : > { %v1149_v63 = vmax.f32 %v2803_v59, 0.0  ;;  %v1104_v0 = vadd.f32 %v1100_v61, %v1067_v60  ;;  %v1516_v61 = vld [vmem:[#allocation8 + $0x10] sm:$0xff]  ;;  %v1894_v59 = vld [vmem:[%s3015_s3] sm:$0xff] }
 0x164   : > { %1151 = vst.msk [vmem:[#allocation2 + $0x8] sm:$0xff] %vm885_vm0, %v1149_v63  ;;  %v1110_v1 = vadd.f32 %v2305_v51, %v1104_v0 }
 0x166   : > { %v1112_v3 = vmax.f32 %v1110_v1, 0.0  ;;  %v1620_v1 = vld [vmem:[%s2977_s20] sm:$0xff] }
 0x168   : > { %v2809_v4 = vadd.f32 %v1145_v2, %v1112_v3 }
 0x16a   : > { %v1150_v5 = vmax.f32 %v2809_v4, 0.0  ;;  %v2313_v4 = vld [vmem:[%s2979_s22] ss:$0 sm:$0xff] }
 0x16b   : > { %v1157_v6 = vld [vmem:[#allocation2 + $0x6] sm:$0xff] }
 0x16c   : > { %v1153_v7 = vld [vmem:[#allocation2 + $0x4] sm:$0xff]  ;;  %1152 = vst.msk [vmem:[#allocation2 + $0x10] sm:$0xff] %vm885_vm0, %v1150_v5  ;;  %2181 = vmatmul.msk.f32.vlgmr.msrb.gmra.mxu3 %vm885_vm0, %v1157_v6 }
 0x16d   : > { %v1220_v8 = vld [vmem:[#allocation2 + $0x8] sm:$0xff]  ;;  %2183 = vmatmul.msk.f32.vlgmr.msra.gmra.mxu0 %vm885_vm0, %v1153_v7  ;;  %2199 = vmatpush.msk.msrb.mxu3 %vm1401_vm2, %v1464_v19 }
 0x16e   : > { %2185 = vmatmul.msk.f32.vlgmr.msra.gmra.mxu1 %vm885_vm0, %v1220_v8  ;;  %1538 = vmatpush.msra.mxu0 %v1517_v54 }
 0x16f   : > { %1489 = vmatpush.msrb.mxu3 %v1463_v22  ;;  %1567 = vmatpush.msra.mxu1 %v1512_v55 }
 0x170   : > { %1539 = vmatpush.msra.mxu0 %v1516_v61 }
 0x171   : > { %1568 = vmatpush.msra.mxu1 %v1511_v62 }
 0x173   : > { %v1158_v9 = vld [vmem:[#allocation2 + $0xe] sm:$0xff] }
 0x174   : > { %v1154_v10 = vld [vmem:[#allocation2 + $0xc] sm:$0xff]  ;;  %2182 = vmatmul.msk.f32.gmra.mxu3 %vm885_vm0, %v1158_v9 }
 0x175   : > { %v1221_v11 = vld [vmem:[#allocation2 + $0x10] sm:$0xff]  ;;  %2184 = vmatmul.msk.f32.gmra.mxu0 %vm885_vm0, %v1154_v10 }
 0x176   : > { %2186 = vmatmul.msk.f32.gmra.mxu1 %vm885_vm0, %v1221_v11 }
 0x1ea   : > { %v1214_v24 = vpop.f32.mrf.mxu0 }
 0x1eb   : > { %v1248_v25 = vpop.f32.mrf.mxu1 }
 0x1ef   : > { %v1185_v26 = vpop.f32.mrf.mxu3 }
 0x1f0   : > { %v1215_v27 = vadd.f32 %v1214_v24, %v1185_v26 }
 0x1f2   : > { %v1254_v29 = vadd.f32 %v1248_v25, %v1215_v27  ;;  %v1217_v32 = vpop.f32.mrf.mxu0 }
 0x1f3   : > { %v1251_v35 = vpop.f32.mrf.mxu1 }
 0x1f4   : > { %v1260_v30 = vadd.f32 %v2307_v28, %v1254_v29 }
 0x1f6   : > { %v1262_v31 = vmax.f32 %v1260_v30, 0.0  ;;  %v1735_v30 = vld [vmem:[#allocation10 + $0x28] sm:$0xff] }
 0x1f7   : > { %v1188_v33 = vpop.f32.mrf.mxu3 }
 0x1f8   : > { %1264 = vst.msk [vmem:[#allocation2 + $0x8] sm:$0xff] %vm885_vm0, %v1262_v31  ;;  %v1218_v34 = vadd.f32 %v1217_v32, %v1188_v33  ;;  %v1672_v31 = vld [vmem:[#allocation10 + $0x18] sm:$0xff]  ;;  %v1667_v32 = vld [vmem:[#allocation10 + $0x8] sm:$0xff]  ;;  %v1734_v33 = vld [vmem:[#allocation10 + $0x20] sm:$0xff] }
 0x1fa   : > { %v1255_v36 = vadd.f32 %v1251_v35, %v1218_v34  ;;  %v1671_v34 = vld [vmem:[#allocation10 + $0x10] sm:$0xff]  ;;  %v1666_v35 = vld [vmem:[#allocation10] sm:$0xff] }
 0x1fc   : > { %v1261_v37 = vadd.f32 %v2307_v28, %v1255_v36 }
 0x1fe   : > { %v1263_v38 = vmax.f32 %v1261_v37, 0.0 }
 0x1ff   : > { %v1270_v39 = vld [vmem:[#allocation2 + $0x6] sm:$0xff] }
 0x200   : > { %v1266_v40 = vld [vmem:[#allocation2 + $0x4] sm:$0xff]  ;;  %1265 = vst.msk [vmem:[#allocation2 + $0x10] sm:$0xff] %vm885_vm0, %v1263_v38  ;;  %2187 = vmatmul.msk.f32.vlgmr.msra.gmra.mxu2 %vm885_vm0, %v1270_v39 }
 0x201   : > { %v1333_v41 = vld [vmem:[#allocation2 + $0x8] sm:$0xff]  ;;  %2189 = vmatmul.msk.f32.vlgmr.msra.gmra.mxu3 %vm885_vm0, %v1266_v40  ;;  %1601 = vmatpush.msra.mxu2 %v1580_v53 }
 0x202   : > { %2191 = vmatmul.msk.f32.vlgmr.msrb.gmra.mxu0 %vm885_vm0, %v1333_v41  ;;  %2208 = vmatpush.msk.msra.mxu3 %vm1401_vm2, %v1621_v56  ;;  %v2310_v41 = vld [vmem:[%s2973_s16] ss:$0 sm:$0xff] }
 0x203   : > { %1602 = vmatpush.msra.mxu2 %v1579_v57  ;;  %1693 = vmatpush.msrb.mxu0 %v1672_v31  ;;  %v2308_v31 = vld [vmem:[%s2969_s12] ss:$0 sm:$0xff] }
 0x204   : > { %1650 = vmatpush.msra.mxu3 %v1620_v1 }
 0x205   : > { %1694 = vmatpush.msrb.mxu0 %v1671_v34 }
 0x207   : > { %v1271_v44 = vld [vmem:[#allocation2 + $0xe] sm:$0xff] }
 0x208   : > { %v1267_v45 = vld [vmem:[#allocation2 + $0xc] sm:$0xff]  ;;  %2188 = vmatmul.msk.f32.gmra.mxu2 %vm885_vm0, %v1271_v44 }
 0x209   : > { %v1334_v46 = vld [vmem:[#allocation2 + $0x10] sm:$0xff]  ;;  %2190 = vmatmul.msk.f32.gmra.mxu3 %vm885_vm0, %v1267_v45  ;;  %1384 = vst.msk [vmem:[#allocation2 + $0x8] sm:$0xff] %vm1383_vm3, %v1381_v42 }
 0x20a   : > { %2192 = vmatmul.msk.f32.gmra.mxu0 %vm885_vm0, %v1334_v46  ;;  %1385 = vst.msk [vmem:[#allocation2 + $0x10] sm:$0xff] %vm1383_vm3, %v1382_v43 }
 0x210   : > { %v1386_v47 = vld [vmem:[#allocation2 + $0x6] sm:$0xff] }
 0x211   : > { %v1460_v48 = vld [vmem:[#allocation2 + $0x8] sm:$0xff]  ;;  %2197 = vmatmul.msk.f32.vlgmr.msrb.gmra.mxu2 %vm1383_vm3, %v1386_v47  ;;  %v1461_v51 = vld [vmem:[#allocation2 + $0x10] sm:$0xff] }
 0x212   : > { %v1390_v49 = vld [vmem:[#allocation2 + $0x7] sm:$0xff]  ;;  %2200 = vmatmul.msk.f32.vlgmr.msrb.gmra.mxu3 %vm1383_vm3, %v1460_v48  ;;  %v1391_v52 = vld [vmem:[#allocation2 + $0xf] sm:$0xff]  ;;  %1756 = vmatpush.msrb.mxu2 %v1735_v30 }
 0x213   : > { %2194 = vmatmul.msk.f32.vlgmr.msrb.gmra.mxu1 %vm1383_vm3, %v1390_v49  ;;  %v1387_v50 = vld [vmem:[#allocation2 + $0xe] sm:$0xff] }
 0x214   : > { %1722 = vmatpush.msrb.mxu1 %v1667_v32  ;;  %1757 = vmatpush.msrb.mxu2 %v1734_v33 }
 0x216   : > { %1723 = vmatpush.msrb.mxu1 %v1666_v35 }
 0x219   : > { %2198 = vmatmul.msk.f32.gmra.mxu2 %vm1383_vm3, %v1387_v50 }
 0x21a   : > { %2201 = vmatmul.msk.f32.gmra.mxu3 %vm1383_vm3, %v1461_v51 }
 0x21b   : > { %2195 = vmatmul.msk.f32.gmra.mxu1 %vm1383_vm3, %v1391_v52 }
 0x222   : > { %2209 = vmatmul.msk.f32.vlgmr.msra.gmra.mxu3 %vm1383_vm3, %v1381_v42  ;;  %v2311_v42 = vld [vmem:[%s2974_s17] ss:$0 sm:$0xff] }
 0x22a   : > { %2210 = vmatmul.msk.f32.gmra.mxu3 %vm1383_vm3, %v1382_v43 }
 0x27f   : > { %v1361_v2 = vpop.f32.mrf.mxu0 }
 0x283   : > { %v1298_v58 = vpop.f32.mrf.mxu2 }
 0x284   : > { %v1327_v60 = vpop.f32.mrf.mxu3 }
 0x285   : > { %v1328_v0 = vadd.f32 %v1327_v60, %v1298_v58 }
 0x287   : > { %v2854_v3 = vadd.f32 %v1361_v2, %v1328_v0  ;;  %v2871_v36 = vpop.f32.mrf.mxu0 }
 0x28b   : > { %v1301_v6 = vpop.f32.mrf.mxu2 }
 0x28c   : > { %v1330_v7 = vpop.f32.mrf.mxu3 }
 0x28d   : > { %v2857_v8 = vadd.f32 %v1330_v7, %v1301_v6 }
 0x290   : > { %v1422_v9 = vpop.f32.mrf.mxu1 }
 0x294   : > { %v1454_v10 = vpop.f32.mrf.mxu2 }
 0x295   : > { %v1491_v11 = vpop.f32.mrf.mxu3  ;;  %v1455_v12 = vadd.f32 %v1454_v10, %v1422_v9  ;;  %v1785_v9 = vld [vmem:[#allocation11 + $0x18] sm:$0xff]  ;;  %v1780_v10 = vld [vmem:[#allocation11 + $0x8] sm:$0xff] }
 0x296   : > { %1806 = vmatpush.msrb.mxu3 %v1785_v9 }
 0x297   : > { %v1497_v14 = vadd.f32 %v1491_v11, %v1455_v12  ;;  %v1784_v11 = vld [vmem:[#allocation11 + $0x10] sm:$0xff]  ;;  %v1848_v12 = vld [vmem:[#allocation11 + $0x28] sm:$0xff] }
 0x298   : > { %v1425_v16 = vpop.f32.mrf.mxu1  ;;  %1807 = vmatpush.msrb.mxu3 %v1784_v11 }
 0x299   : > { %v1503_v15 = vadd.f32 %v2309_v13, %v1497_v14  ;;  %v1847_v14 = vld [vmem:[#allocation11 + $0x20] sm:$0xff] }
 0x29b   : > { %v1505_v17 = vmax.f32 %v1503_v15, 0.0  ;;  %v1893_v15 = vld [vmem:[%s3014_s7 + $0x8] sm:$0xff] }
 0x29c   : > { %v1457_v18 = vpop.f32.mrf.mxu2  ;;  %1945 = vmatpush.msra.mxu3 %v1893_v15 }
 0x29d   : > { %v1494_v19 = vpop.f32.mrf.mxu3  ;;  %1507 = vst.msk [vmem:[#allocation2 + $0x8] sm:$0xff] %vm885_vm0, %v1505_v17  ;;  %v1458_v20 = vadd.f32 %v1457_v18, %v1425_v16  ;;  %v1892_v16 = vld [vmem:[%s3014_s7] sm:$0xff] }
 0x29e   : > { %1946 = vmatpush.msra.mxu3 %v1892_v16 }
 0x29f   : > { %v1498_v21 = vadd.f32 %v1494_v19, %v1458_v20  ;;  %v2312_v20 = vld [vmem:[%s2978_s21] ss:$0 sm:$0xff] }
 0x2a1   : > { %v1504_v22 = vadd.f32 %v2309_v13, %v1498_v21  ;;  %v1779_v13 = vld [vmem:[#allocation11] sm:$0xff] }
 0x2a3   : > { %v1506_v23 = vmax.f32 %v1504_v22, 0.0 }
 0x2a4   : > { %v1513_v24 = vld [vmem:[#allocation2 + $0x7] sm:$0xff] }
 0x2a5   : > { %v1509_v25 = vld [vmem:[#allocation2 + $0x6] sm:$0xff]  ;;  %1508 = vst.msk [vmem:[#allocation2 + $0x10] sm:$0xff] %vm885_vm0, %v1506_v23  ;;  %2202 = vmatmul.msk.f32.vlgmr.msra.gmra.mxu0 %vm885_vm0, %v1513_v24  ;;  %v1652_v39 = vpop.f32.mrf.mxu3 }
 0x2a6   : > { %v1576_v26 = vld [vmem:[#allocation2 + $0x8] sm:$0xff]  ;;  %2204 = vmatmul.msk.f32.vlgmr.msra.gmra.mxu1 %vm885_vm0, %v1509_v25  ;;  %v1653_v46 = vadd.f32 %v2311_v42, %v1652_v39  ;;  %1835 = vmatpush.msra.mxu0 %v1780_v10  ;;  %v1368_v39 = vadd.f32 %v2871_v36, %v2857_v8 }
 0x2a7   : > { %2206 = vmatmul.msk.f32.vlgmr.msra.gmra.mxu2 %vm885_vm0, %v1576_v26  ;;  %1869 = vmatpush.msra.mxu1 %v1848_v12  ;;  %v1895_v36 = vld [vmem:[%s3015_s3 + $0x8] sm:$0xff] }
 0x2a8   : > { %1836 = vmatpush.msra.mxu0 %v1779_v13  ;;  %1916 = vmatpush.msra.mxu2 %v1895_v36 }
 0x2a9   : > { %1870 = vmatpush.msra.mxu1 %v1847_v14 }
 0x2aa   : > { %1917 = vmatpush.msra.mxu2 %v1894_v59 }
 0x2ac   : > { %v1514_v27 = vld [vmem:[#allocation2 + $0xf] sm:$0xff] }
 0x2ad   : > { %v1510_v28 = vld [vmem:[#allocation2 + $0xe] sm:$0xff]  ;;  %2203 = vmatmul.msk.f32.gmra.mxu0 %vm885_vm0, %v1514_v27  ;;  %v1655_v53 = vpop.f32.mrf.mxu3 }
 0x2ae   : > { %v1577_v29 = vld [vmem:[#allocation2 + $0x10] sm:$0xff]  ;;  %2205 = vmatmul.msk.f32.gmra.mxu1 %vm885_vm0, %v1510_v28  ;;  %v1656_v57 = vadd.f32 %v2311_v42, %v1655_v53 }
 0x2af   : > { %2207 = vmatmul.msk.f32.gmra.mxu2 %vm885_vm0, %v1577_v29 }
 0x322   : > { %v1541_v37 = vpop.f32.mrf.mxu0 }
 0x323   : > { %v1570_v38 = vpop.f32.mrf.mxu1 }
 0x324   : > { %v1571_v40 = vadd.f32 %v1570_v38, %v1541_v37  ;;  %v1373_v37 = vadd.f32 %v2308_v31, %v2854_v3 }
 0x326   : > { %v1375_v38 = vmax.f32 %v1373_v37, 0.0 }
 0x32a   : > { %v1604_v43 = vpop.f32.mrf.mxu2  ;;  %v1544_v47 = vpop.f32.mrf.mxu0 }
 0x32b   : > { %v1610_v44 = vadd.f32 %v1604_v43, %v1571_v40  ;;  %v1573_v48 = vpop.f32.mrf.mxu1  ;;  %v1377_v43 = vadd.f32 %v1375_v38, %v1149_v63 }
 0x32c   : > { %v1574_v50 = vadd.f32 %v1573_v48, %v1544_v47 }
 0x32d   : > { %v1616_v45 = vadd.f32 %v2310_v41, %v1610_v44  ;;  %v1374_v44 = vadd.f32 %v2308_v31, %v1368_v39 }
 0x32f   : > { %v1618_v49 = vmax.f32 %v1616_v45, 0.0  ;;  %v1379_v45 = vmax.f32 %v1377_v43, 0.0 }
 0x331   : > { %v2879_v51 = vadd.f32 %v1653_v46, %v1618_v49  ;;  %v1376_v46 = vmax.f32 %v1374_v44, 0.0 }
 0x332   : > { %v1607_v52 = vpop.f32.mrf.mxu2 }
 0x333   : > { %v1660_v54 = vmax.f32 %v2879_v51, 0.0  ;;  %v1611_v55 = vadd.f32 %v1607_v52, %v1574_v50  ;;  %v1378_v3 = vadd.f32 %v1376_v46, %v1150_v5  ;;  %v2314_v51 = vld [vmem:[%s3016_s2] ss:$0 sm:$0xff] }
 0x335   : > { %1662 = vst.msk [vmem:[#allocation2 + $0x8] sm:$0xff] %vm885_vm0, %v1660_v54  ;;  %v1617_v56 = vadd.f32 %v2310_v41, %v1611_v55  ;;  %v1380_v8 = vmax.f32 %v1378_v3, 0.0 }
 0x337   : > { %v1619_v58 = vmax.f32 %v1617_v56, 0.0 }
 0x339   : > { %v2885_v60 = vadd.f32 %v1656_v57, %v1619_v58 }
 0x33b   : > { %v1661_v61 = vmax.f32 %v2885_v60, 0.0 }
 0x33c   : > { %v1668_v62 = vld [vmem:[#allocation2 + $0x6] sm:$0xff] }
 0x33d   : > { %v1664_v0 = vld [vmem:[#allocation2 + $0x4] sm:$0xff]  ;;  %1663 = vst.msk [vmem:[#allocation2 + $0x10] sm:$0xff] %vm885_vm0, %v1661_v61  ;;  %2211 = vmatmul.msk.f32.vlgmr.msrb.gmra.mxu0 %vm885_vm0, %v1668_v62 }
 0x33e   : > { %v1731_v1 = vld [vmem:[#allocation2 + $0x8] sm:$0xff]  ;;  %2213 = vmatmul.msk.f32.vlgmr.msrb.gmra.mxu1 %vm885_vm0, %v1664_v0 }
 0x33f   : > { %2215 = vmatmul.msk.f32.vlgmr.msrb.gmra.mxu2 %vm885_vm0, %v1731_v1 }
 0x344   : > { %v1669_v2 = vld [vmem:[#allocation2 + $0xe] sm:$0xff] }
 0x345   : > { %v1665_v6 = vld [vmem:[#allocation2 + $0xc] sm:$0xff]  ;;  %2212 = vmatmul.msk.f32.gmra.mxu0 %vm885_vm0, %v1669_v2 }
 0x346   : > { %v1732_v7 = vld [vmem:[#allocation2 + $0x10] sm:$0xff]  ;;  %2214 = vmatmul.msk.f32.gmra.mxu1 %vm885_vm0, %v1665_v6 }
 0x347   : > { %2216 = vmatmul.msk.f32.gmra.mxu2 %vm885_vm0, %v1732_v7 }
 0x3ba   : > { %v1696_v17 = vpop.f32.mrf.mxu0 }
 0x3bb   : > { %v1725_v18 = vpop.f32.mrf.mxu1 }
 0x3bc   : > { %v1726_v19 = vadd.f32 %v1725_v18, %v1696_v17 }
 0x3c2   : > { %v1759_v21 = vpop.f32.mrf.mxu2  ;;  %v1699_v24 = vpop.f32.mrf.mxu0 }
 0x3c3   : > { %v1765_v22 = vadd.f32 %v1759_v21, %v1726_v19  ;;  %v1728_v25 = vpop.f32.mrf.mxu1 }
 0x3c4   : > { %v1729_v27 = vadd.f32 %v1728_v25, %v1699_v24 }
 0x3c5   : > { %v1771_v23 = vadd.f32 %v2312_v20, %v1765_v22 }
 0x3c7   : > { %v1773_v26 = vmax.f32 %v1771_v23, 0.0 }
 0x3c9   : > { %1775 = vst.msk [vmem:[#allocation2 + $0x8] sm:$0xff] %vm885_vm0, %v1773_v26 }
 0x3ca   : > { %v1762_v28 = vpop.f32.mrf.mxu2 }
 0x3cb   : > { %v1766_v29 = vadd.f32 %v1762_v28, %v1729_v27 }
 0x3cd   : > { %v1772_v30 = vadd.f32 %v2312_v20, %v1766_v29 }
 0x3cf   : > { %v1774_v32 = vmax.f32 %v1772_v30, 0.0 }
 0x3d0   : > { %v1781_v33 = vld [vmem:[#allocation2 + $0x6] sm:$0xff] }
 0x3d1   : > { %v1777_v34 = vld [vmem:[#allocation2 + $0x4] sm:$0xff]  ;;  %1776 = vst.msk [vmem:[#allocation2 + $0x10] sm:$0xff] %vm885_vm0, %v1774_v32  ;;  %2217 = vmatmul.msk.f32.vlgmr.msrb.gmra.mxu3 %vm885_vm0, %v1781_v33 }
 0x3d2   : > { %v1844_v35 = vld [vmem:[#allocation2 + $0x8] sm:$0xff]  ;;  %2219 = vmatmul.msk.f32.vlgmr.msra.gmra.mxu0 %vm885_vm0, %v1777_v34 }
 0x3d3   : > { %2221 = vmatmul.msk.f32.vlgmr.msra.gmra.mxu1 %vm885_vm0, %v1844_v35 }
 0x3d8   : > { %v1782_v40 = vld [vmem:[#allocation2 + $0xe] sm:$0xff] }
 0x3d9   : > { %v1778_v41 = vld [vmem:[#allocation2 + $0xc] sm:$0xff]  ;;  %2218 = vmatmul.msk.f32.gmra.mxu3 %vm885_vm0, %v1782_v40 }
 0x3da   : > { %v1845_v42 = vld [vmem:[#allocation2 + $0x10] sm:$0xff]  ;;  %2220 = vmatmul.msk.f32.gmra.mxu0 %vm885_vm0, %v1778_v41 }
 0x3db   : > { %2222 = vmatmul.msk.f32.gmra.mxu1 %vm885_vm0, %v1845_v42 }
 0x3e1   : > { %2225 = vmatmul.msk.f32.vlgmr.msra.gmra.mxu3 %vm885_vm0, %v1379_v45 }
 0x3e9   : > { %2226 = vmatmul.msk.f32.gmra.mxu3 %vm885_vm0, %v1380_v8 }
 0x44f   : > { %v1838_v63 = vpop.f32.mrf.mxu0 }
 0x450   : > { %v1872_v47 = vpop.f32.mrf.mxu1 }
 0x454   : > { %v1809_v48 = vpop.f32.mrf.mxu3 }
 0x455   : > { %v1839_v49 = vadd.f32 %v1838_v63, %v1809_v48 }
 0x457   : > { %v1878_v5 = vadd.f32 %v1872_v47, %v1839_v49  ;;  %v1841_v53 = vpop.f32.mrf.mxu0 }
 0x458   : > { %v1875_v58 = vpop.f32.mrf.mxu1 }
 0x459   : > { %v1884_v50 = vadd.f32 %v2313_v4, %v1878_v5 }
 0x45b   : > { %v1886_v52 = vmax.f32 %v1884_v50, 0.0 }
 0x45c   : > { %v1812_v55 = vpop.f32.mrf.mxu3 }
 0x45d   : > { %v1888_v56 = vadd.f32 %v1886_v52, %v1660_v54  ;;  %v1842_v57 = vadd.f32 %v1841_v53, %v1812_v55 }
 0x45f   : > { %v1890_v62 = vmax.f32 %v1888_v56, 0.0  ;;  %v1879_v0 = vadd.f32 %v1875_v58, %v1842_v57 }
 0x461   : > { %v1885_v1 = vadd.f32 %v2313_v4, %v1879_v0  ;;  %2223 = vmatmul.msk.f32.vlgmr.msra.gmra.mxu2 %vm885_vm0, %v1890_v62 }
 0x463   : > { %v1887_v2 = vmax.f32 %v1885_v1, 0.0 }
 0x464   : > { %v1948_v9 = vpop.f32.mrf.mxu3 }
 0x465   : > { %v1889_v6 = vadd.f32 %v1887_v2, %v1661_v61 }
 0x467   : > { %v1891_v7 = vmax.f32 %v1889_v6, 0.0 }
 0x469   : > { %2224 = vmatmul.msk.f32.gmra.mxu2 %vm885_vm0, %v1891_v7 }
 0x46c   : > { %v1951_v13 = vpop.f32.mrf.mxu3 }
 0x4e4   : > { %v1919_v54 = vpop.f32.mrf.mxu2 }
 0x4e5   : > { %v1949_v10 = vadd.f32 %v1948_v9, %v1919_v54 }
 0x4e7   : > { %v1958_v11 = vadd.f32 %v2314_v51, %v1949_v10 }
 0x4e9   : > { %v1961_v12 = vsel %vm1960_vm4, %v1958_v11, -inf }
 0x4ea   : > { %1962 = vmax.xlane.f32.xlu0 %v1961_v12 }
 0x4ec   : > { %v1922_v14 = vpop.f32.mrf.mxu2 }
 0x4ed   : > { %v1952_v15 = vadd.f32 %v1951_v13, %v1922_v14 }
 0x4ef   : > { %v1959_v60 = vadd.f32 %v2314_v51, %v1952_v15 }
 0x4f1   : > { %v1964_v61 = vsel %vm1960_vm4, %v1959_v60, -inf }
 0x4f2   : > { %1965 = vmax.xlane.f32.xlu0 %v1964_v61 }
 0x55d   : > { %v1963_v16 = vpop.xlane.xlu0 %1962 }
 0x55e   : > { %v1967_v17 = vsub.f32 %v1958_v11, %v1963_v16 }
 0x560   : > { %v1969_v18 = vmul.f32 1.442695, %v1967_v17 }
 0x562   : > { %2315 = vpow2.f32 %v1969_v18 }
 0x565   : > { %v1966_v19 = vpop.xlane.xlu0 %1965 }
 0x566   : > { %v1968_v20 = vsub.f32 %v1959_v60, %v1966_v19 }
 0x568   : > { %v2316_v21 = vpop.eup %2315  ;;  %v1971_v22 = vmul.f32 1.442695, %v1968_v20 }
 0x569   : > { %v1973_v23 = vsel %vm1960_vm4, %v2316_v21, 0.0 }
 0x56a   : > { %2317 = vpow2.f32 %v1971_v22  ;;  %1974 = vadd.xlane.f32.xlu1 %v1973_v23 }
 0x570   : > { %v2318_v24 = vpop.eup %2317 }
 0x571   : > { %v1976_v25 = vsel %vm1960_vm4, %v2318_v24, 0.0 }
 0x572   : > { %1977 = vadd.xlane.f32.xlu1 %v1976_v25 }
 0x5dd   : > { %v1975_v26 = vpop.xlane.xlu1 %1974 }
 0x5de   : > { %2319 = vrcp.f32 %v1975_v26  ;;  %v1990_v31 = vand.u32 2147483648, %v1975_v26  ;;  %v1988_v33 = vand.u32 2147483647, %v1975_v26  ;;  %vm1984_vm6 = vweird.f32 %v1975_v26 }
 0x5e0   : > { %v1991_v37 = vor.u32 1.1754944e-38, %v1990_v31  ;;  %vm1989_vm8 = vcmp.eq.f32.partialorder %v1988_v33, 8.507059e+37 }
 0x5e4   : > { %v2320_v27 = vpop.eup %2319 }
 0x5e5   : > { %v1980_v28 = vmul.f32 %v2320_v27, %v1975_v26  ;;  %v1978_v29 = vpop.xlane.xlu1 %1977  ;;  %vm1985_vm5 = vweird.f32 %v2320_v27 }
 0x5e6   : > { %2321 = vrcp.f32 %v1978_v29  ;;  %vm1986_vm7 = vmor %vm1984_vm6, %vm1985_vm5  ;;  %v2004_v43 = vand.u32 2147483648, %v1978_v29  ;;  %v2002_v45 = vand.u32 2147483647, %v1978_v29  ;;  %vm1998_vm10 = vweird.f32 %v1978_v29 }
 0x5e7   : > { %v1981_v30 = vsub.f32 1.0, %v1980_v28 }
 0x5e8   : > { %v2005_v3 = vor.u32 1.1754944e-38, %v2004_v43  ;;  %vm2003_vm12 = vcmp.eq.f32.partialorder %v2002_v45, 8.507059e+37 }
 0x5e9   : > { %v1982_v32 = vmul.f32 %v2320_v27, %v1981_v30 }
 0x5eb   : > { %v1983_v34 = vadd.f32 %v2320_v27, %v1982_v32 }
 0x5ec   : > { %v2322_v35 = vpop.eup %2321 }
 0x5ed   : > { %v1987_v38 = vsel %vm1986_vm7, %v2320_v27, %v1983_v34  ;;  %v1994_v39 = vmul.f32 %v2322_v35, %v1978_v29  ;;  %vm1999_vm9 = vweird.f32 %v2322_v35 }
 0x5ee   : > { %v1992_v40 = vsel %vm1989_vm8, %v1991_v37, %v1987_v38  ;;  %vm2000_vm11 = vmor %vm1998_vm10, %vm1999_vm9 }
 0x5ef   : > { %v2007_v41 = vmul.f32 %v2316_v21, %v1992_v40  ;;  %v1995_v42 = vsub.f32 1.0, %v1994_v39 }
 0x5f1   : > { %2009 = vst.msk [vmem:[%s884_s27] sm:$0xff] %vm1960_vm4, %v2007_v41  ;;  %v1996_v44 = vmul.f32 %v2322_v35, %v1995_v42 }
 0x5f3   : > { %v1997_v46 = vadd.f32 %v2322_v35, %v1996_v44 }
 0x5f5   : > { %v2001_v8 = vsel %vm2000_vm11, %v2322_v35, %v1997_v46 }
 0x5f6   : > { %v2006_v36 = vsel %vm2003_vm12, %v2005_v3, %v2001_v8 }
 0x5f7   : > { %v2008_v59 = vmul.f32 %v2318_v24, %v2006_v36 }
 0x5f9   : > { %2010 = vst.msk [vmem:[%s884_s27 + $0x8] sm:$0xff] %vm1960_vm4, %v2008_v59 }
 0x5fa PF: > { %s3017_s13 = sld [smem:[#allocation17_spill]] }
 0x600   : > { %s39_s29 = sadd.s32 1, %s3017_s13  }
 0x601   : > { %p36_p7 = scmp.ge.s32.totalorder %s39_s29, 4  }
 0x603   :  { %38 = sbr.rel (!%p36_p7) target bundleno = 18 (0x12), region = 194 }
 0x608   :  { %2032 = vsyncpa [#allocation4], 1 }
 0x609   :  { %2034 = vsyncpa [#allocation4 + $0x1], 1 }
 0x60a   :  { %2035 = vsyncpa [#allocation6], 1 }
 0x60b   :  { %2036 = vsyncpa [#allocation9], 1 }
 0x60c   :  { %2037 = vsyncpa [#allocation12], 1 }

</bundles_post_ra>
